<compile_context>
chip_gen: v7x
topology: tpu7x:2x2x1
jax: 0.10.0
libtpu: 0.0.40
codegen_flags: <defaults>
</compile_context>

<pallas_src>
import jax
import jax.numpy as jnp
from jax import lax
from jax.experimental import pallas as pl
from jax.experimental.pallas import tpu as pltpu

EPS = 1e-5


def _down_kernel(x_ref, w1_ref, t1_ref, w2_ref, t2_ref, o_ref, pad1, pad2):
    # x_ref : (NBLK, H, Wo, 2*Cin) bf16   -- NHWC with the two pooled columns packed
    #                                        next to the channel dim (free reshape).
    # w1_ref: (9*Cin, Cmid)  bf16         -- im2col-flattened, BN-scale folded.
    # t1_ref: (1, Cmid)      f32          -- folded conv bias + BN shift.
    # w2_ref: (9*Cmid, Cmid) bf16
    # t2_ref: (1, Cmid)      f32
    # o_ref : (NBLK, Ho, Wo, Cmid) f32
    # pad1  : VMEM (NBLK, Ho+2, Wo+2, Cin)  f32 scratch (zero halo)
    # pad2  : VMEM (NBLK, Ho+2, Wo+2, Cmid) f32 scratch (zero halo)
    nblk, H, Wo, twoc = x_ref.shape
    Ho = H // 2
    Cin = twoc // 2
    Cmid = t1_ref.shape[1]
    M = nblk * Ho * Wo

    # ---- Keep the 1-pixel zero halo valid (border-only stores; the interior is fully
    #      rewritten below, so every grid step is self-contained -> safe with "parallel").
    for pad, C in ((pad1, Cin), (pad2, Cmid)):
        row = jnp.zeros((nblk, 1, Wo + 2, C), jnp.float32)
        col = jnp.zeros((nblk, Ho + 2, 1, C), jnp.float32)
        pad[:, 0:1, :, :] = row
        pad[:, Ho + 1:Ho + 2, :, :] = row
        pad[:, :, 0:1, :] = col
        pad[:, :, Wo + 1:Wo + 2, :] = col

    # ---- MaxPool2d(2), in-kernel.
    x = x_ref[...].astype(jnp.float32)                  # (nblk, H, Wo, 2*Cin)
    x = x.reshape(nblk * Ho, 2, Wo, twoc)               # split H only (minor dims untouched)
    x = jnp.max(x, axis=1)                              # pool over H pairs
    pooled = jnp.maximum(x[..., :Cin], x[..., Cin:])    # pool over W pairs -> (nblk*Ho, Wo, Cin)

    # ---- Conv1 (3x3, pad=1): im2col slab -> single MXU matmul -> +bias -> ReLU.
    pad1[:, 1:Ho + 1, 1:Wo + 1, :] = pooled.reshape(nblk, Ho, Wo, Cin)
    taps1 = [pad1[:, dy:dy + Ho, dx:dx + Wo, :].reshape(M, Cin)
             for dy in range(3) for dx in range(3)]
    slab1 = jnp.concatenate(taps1, axis=-1).astype(jnp.bfloat16)     # (M, 9*Cin)
    acc1 = jnp.dot(slab1, w1_ref[...], preferred_element_type=jnp.float32)
    h = jnp.maximum(acc1 + t1_ref[...], 0.0)                          # (M, Cmid) f32

    # ---- Conv2 (3x3, pad=1): same pattern.
    pad2[:, 1:Ho + 1, 1:Wo + 1, :] = h.reshape(nblk, Ho, Wo, Cmid)
    taps2 = [pad2[:, dy:dy + Ho, dx:dx + Wo, :].reshape(M, Cmid)
             for dy in range(3) for dx in range(3)]
    slab2 = jnp.concatenate(taps2, axis=-1).astype(jnp.bfloat16)     # (M, 9*Cmid)
    acc2 = jnp.dot(slab2, w2_ref[...], preferred_element_type=jnp.float32)
    out = jnp.maximum(acc2 + t2_ref[...], 0.0)                        # (M, Cmid) f32

    o_ref[...] = out.reshape(nblk, Ho, Wo, Cmid).astype(o_ref.dtype)


def _fold_bn_into_conv(w, b, gamma, beta, mean, var):
    """Fold inference BatchNorm into the conv: returns (w*scale, shift)."""
    scale = gamma / jnp.sqrt(var + EPS)                # (Cout,)
    return w * scale, (b - mean) * scale + beta


def down_forward(x_nchw, raw_params, *, nblk=None):
    """Pallas implementation of Down.forward. Input/output are NCHW (PyTorch style)."""
    (w1, b1, g1, be1, m1, v1, w2, b2, g2, be2, m2, v2) = raw_params
    N, Cin, H, W = x_nchw.shape
    Cmid = w1.shape[-1]
    Ho, Wo = H // 2, W // 2

    # Fold all of a (small) batch into one grid step so matmul M = nblk*Ho*Wo.
    # For real UNet sizes, cap nblk and/or tile Ho with a 1-row halo to respect
    # VMEM limits (esp. v7x's 64 MiB) -- not needed at this toy size.
    if nblk is None:
        nblk = N
    assert N % nblk == 0

    w1f, t1 = _fold_bn_into_conv(w1, b1, g1, be1, m1, v1)
    w2f, t2 = _fold_bn_into_conv(w2, b2, g2, be2, m2, v2)
    w1f = w1f.reshape(9 * Cin, Cmid).astype(jnp.bfloat16)      # im2col layout (dy,dx,cin)-major
    w2f = w2f.reshape(9 * Cmid, Cmid).astype(jnp.bfloat16)
    t1 = t1.reshape(1, Cmid).astype(jnp.float32)
    t2 = t2.reshape(1, Cmid).astype(jnp.float32)

    # Single boundary transpose NCHW -> NHWC (bf16), then a *contiguous* (free) reshape
    # (W, Cin) -> (Wo, 2*Cin) so the pool's W-pair lives in the lane dim.
    x = jnp.transpose(x_nchw, (0, 2, 3, 1)).astype(jnp.bfloat16)   # (N, H, W, Cin)
    x = x.reshape(N, H, Wo, 2 * Cin)

    out = pl.pallas_call(
        _down_kernel,
        out_shape=jax.ShapeDtypeStruct((N, Ho, Wo, Cmid), jnp.float32),
        grid_spec=pltpu.PrefetchScalarGridSpec(
            num_scalar_prefetch=0,
            grid=(N // nblk,),
            in_specs=[
                pl.BlockSpec((nblk, H, Wo, 2 * Cin), lambda n: (n, 0, 0, 0)),
                pl.BlockSpec((9 * Cin, Cmid), lambda n: (0, 0)),
                pl.BlockSpec((1, Cmid), lambda n: (0, 0)),
                pl.BlockSpec((9 * Cmid, Cmid), lambda n: (0, 0)),
                pl.BlockSpec((1, Cmid), lambda n: (0, 0)),
            ],
            out_specs=pl.BlockSpec((nblk, Ho, Wo, Cmid), lambda n: (n, 0, 0, 0)),
            scratch_shapes=[
                pltpu.VMEM((nblk, Ho + 2, Wo + 2, Cin), jnp.float32),
                pltpu.VMEM((nblk, Ho + 2, Wo + 2, Cmid), jnp.float32),
            ],
        ),
        compiler_params=pltpu.CompilerParams(
            dimension_semantics=("parallel",)),
    )(x, w1f, t1, w2f, t2)

    return jnp.transpose(out, (0, 3, 1, 2))                         # back to NCHW


def down_reference(x_nchw, raw_params):
    """Pure-JAX fp32 reference (XLA conv) for validation."""
    (w1, b1, g1, be1, m1, v1, w2, b2, g2, be2, m2, v2) = raw_params
    x = jnp.transpose(x_nchw, (0, 2, 3, 1))
    x = lax.reduce_window(x, -jnp.inf, lax.max, (1, 2, 2, 1), (1, 2, 2, 1), "VALID")

    def conv_bn_relu(x, w, b, g, be, m, v):
        y = lax.conv_general_dilated(x, w, (1, 1), "SAME",
                                     dimension_numbers=("NHWC", "HWIO", "NHWC"))
        y = y + b
        y = g * (y - m) / jnp.sqrt(v + EPS) + be
        return jnp.maximum(y, 0.0)

    x = conv_bn_relu(x, w1, b1, g1, be1, m1, v1)
    x = conv_bn_relu(x, w2, b2, g2, be2, m2, v2)
    return jnp.transpose(x, (0, 3, 1, 2))


def init_params(key, in_ch, out_ch):
    ks = jax.random.split(key, 8)
    w1 = 0.2 * jax.random.normal(ks[0], (3, 3, in_ch, out_ch), jnp.float32)
    b1 = 0.1 * jax.random.normal(ks[1], (out_ch,), jnp.float32)
    g1 = 1.0 + 0.1 * jax.random.normal(ks[2], (out_ch,), jnp.float32)
    be1 = 0.1 * jax.random.normal(ks[3], (out_ch,), jnp.float32)
    m1 = jnp.zeros((out_ch,), jnp.float32)       # BN running stats (inference)
    v1 = jnp.ones((out_ch,), jnp.float32)
    w2 = 0.2 * jax.random.normal(ks[4], (3, 3, out_ch, out_ch), jnp.float32)
    b2 = 0.1 * jax.random.normal(ks[5], (out_ch,), jnp.float32)
    g2 = 1.0 + 0.1 * jax.random.normal(ks[6], (out_ch,), jnp.float32)
    be2 = 0.1 * jax.random.normal(ks[7], (out_ch,), jnp.float32)
    m2 = jnp.zeros((out_ch,), jnp.float32)
    v2 = jnp.ones((out_ch,), jnp.float32)
    return (w1, b1, g1, be1, m1, v1, w2, b2, g2, be2, m2, v2)


if __name__ == "__main__":
    # Down(in_channels=4, out_channels=8) on a (2, 4, 16, 16) NCHW input.
    key = jax.random.PRNGKey(0)
    kx, kp = jax.random.split(key)
    x = jax.random.normal(kx, (2, 4, 16, 16), jnp.float32)
    params = init_params(kp, 4, 8)

    out = jax.block_until_ready(down_forward(x, params))   # (2, 8, 8, 8) NCHW
    ref = jax.block_until_ready(down_reference(x, params))

    assert out.shape == (2, 8, 8, 8), out.shape
    # bf16 inputs/weights (fp32 accumulation) vs. fp32 reference -> loosened tolerance.
    assert jnp.allclose(out, ref, atol=5e-2, rtol=5e-2), float(jnp.max(jnp.abs(out - ref)))
    print("KERNEL_OK")
</pallas_src>

<mosaic_0001>
module attributes {stable_mosaic.version = 11 : i64} {
  func.func @_down_kernel(%arg0: i32, %arg1: memref<2x16x8x8xbf16, #tpu.memory_space<vmem>>, %arg2: memref<36x8xbf16, #tpu.memory_space<vmem>>, %arg3: memref<1x8xf32, #tpu.memory_space<vmem>>, %arg4: memref<72x8xbf16, #tpu.memory_space<vmem>>, %arg5: memref<1x8xf32, #tpu.memory_space<vmem>>, %arg6: memref<2x8x8x8xf32, #tpu.memory_space<vmem>>, %arg7: memref<2x10x10x4xf32, #tpu.memory_space<vmem>>, %arg8: memref<2x10x10x8xf32, #tpu.memory_space<vmem>>) attributes {dimension_semantics = [#tpu.dimension_semantics<parallel>], iteration_bounds = array<i64: 1>, scalar_prefetch = 0 : i64, scratch_operands = 2 : i64, tpu.core_type = #tpu.core_type<tc>, window_params = [{transform_indices = @transform_0, window_bounds = array<i64: 2, 16, 8, 8>}, {pipeline_mode = #tpu.pipeline_mode<synchronous>, transform_indices = @transform_1, window_bounds = array<i64: 36, 8>}, {pipeline_mode = #tpu.pipeline_mode<synchronous>, transform_indices = @transform_2, window_bounds = array<i64: 1, 8>}, {pipeline_mode = #tpu.pipeline_mode<synchronous>, transform_indices = @transform_3, window_bounds = array<i64: 72, 8>}, {pipeline_mode = #tpu.pipeline_mode<synchronous>, transform_indices = @transform_4, window_bounds = array<i64: 1, 8>}, {transform_indices = @transform_5, window_bounds = array<i64: 2, 8, 8, 8>}]} {
    %cst = arith.constant 0.000000e+00 : f32
    %0 = vector.broadcast %cst : f32 to vector<2x1x10x4xf32>
    %cst_0 = arith.constant 0.000000e+00 : f32
    %1 = vector.broadcast %cst_0 : f32 to vector<2x10x1x4xf32>
    %c0 = arith.constant 0 : index
    %c0_1 = arith.constant 0 : index
    %c0_2 = arith.constant 0 : index
    %c0_3 = arith.constant 0 : index
    %2 = vector.load %arg7[%c0, %c0_1, %c0_2, %c0_3] : memref<2x10x10x4xf32, #tpu.memory_space<vmem>>, vector<2x1x10x4xf32>
    tpu.vector_store %arg7[%c0, %c0_1, %c0_2, %c0_3], %0 {strides = array<i32>} : memref<2x10x10x4xf32, #tpu.memory_space<vmem>>, vector<2x1x10x4xf32>,
    %c0_4 = arith.constant 0 : index
    %c9 = arith.constant 9 : index
    %c0_5 = arith.constant 0 : index
    %c0_6 = arith.constant 0 : index
    %3 = vector.load %arg7[%c0_4, %c9, %c0_5, %c0_6] : memref<2x10x10x4xf32, #tpu.memory_space<vmem>>, vector<2x1x10x4xf32>
    tpu.vector_store %arg7[%c0_4, %c9, %c0_5, %c0_6], %0 {strides = array<i32>} : memref<2x10x10x4xf32, #tpu.memory_space<vmem>>, vector<2x1x10x4xf32>,
    %c0_7 = arith.constant 0 : index
    %c0_8 = arith.constant 0 : index
    %c0_9 = arith.constant 0 : index
    %c0_10 = arith.constant 0 : index
    %4 = vector.load %arg7[%c0_7, %c0_8, %c0_9, %c0_10] : memref<2x10x10x4xf32, #tpu.memory_space<vmem>>, vector<2x10x1x4xf32>
    tpu.vector_store %arg7[%c0_7, %c0_8, %c0_9, %c0_10], %1 {strides = array<i32>} : memref<2x10x10x4xf32, #tpu.memory_space<vmem>>, vector<2x10x1x4xf32>,
    %c0_11 = arith.constant 0 : index
    %c0_12 = arith.constant 0 : index
    %c9_13 = arith.constant 9 : index
    %c0_14 = arith.constant 0 : index
    %5 = vector.load %arg7[%c0_11, %c0_12, %c9_13, %c0_14] : memref<2x10x10x4xf32, #tpu.memory_space<vmem>>, vector<2x10x1x4xf32>
    tpu.vector_store %arg7[%c0_11, %c0_12, %c9_13, %c0_14], %1 {strides = array<i32>} : memref<2x10x10x4xf32, #tpu.memory_space<vmem>>, vector<2x10x1x4xf32>,
    %cst_15 = arith.constant 0.000000e+00 : f32
    %6 = vector.broadcast %cst_15 : f32 to vector<2x1x10x8xf32>
    %cst_16 = arith.constant 0.000000e+00 : f32
    %7 = vector.broadcast %cst_16 : f32 to vector<2x10x1x8xf32>
    %c0_17 = arith.constant 0 : index
    %c0_18 = arith.constant 0 : index
    %c0_19 = arith.constant 0 : index
    %c0_20 = arith.constant 0 : index
    %8 = vector.load %arg8[%c0_17, %c0_18, %c0_19, %c0_20] : memref<2x10x10x8xf32, #tpu.memory_space<vmem>>, vector<2x1x10x8xf32>
    tpu.vector_store %arg8[%c0_17, %c0_18, %c0_19, %c0_20], %6 {strides = array<i32>} : memref<2x10x10x8xf32, #tpu.memory_space<vmem>>, vector<2x1x10x8xf32>,
    %c0_21 = arith.constant 0 : index
    %c9_22 = arith.constant 9 : index
    %c0_23 = arith.constant 0 : index
    %c0_24 = arith.constant 0 : index
    %9 = vector.load %arg8[%c0_21, %c9_22, %c0_23, %c0_24] : memref<2x10x10x8xf32, #tpu.memory_space<vmem>>, vector<2x1x10x8xf32>
    tpu.vector_store %arg8[%c0_21, %c9_22, %c0_23, %c0_24], %6 {strides = array<i32>} : memref<2x10x10x8xf32, #tpu.memory_space<vmem>>, vector<2x1x10x8xf32>,
    %c0_25 = arith.constant 0 : index
    %c0_26 = arith.constant 0 : index
    %c0_27 = arith.constant 0 : index
    %c0_28 = arith.constant 0 : index
    %10 = vector.load %arg8[%c0_25, %c0_26, %c0_27, %c0_28] : memref<2x10x10x8xf32, #tpu.memory_space<vmem>>, vector<2x10x1x8xf32>
    tpu.vector_store %arg8[%c0_25, %c0_26, %c0_27, %c0_28], %7 {strides = array<i32>} : memref<2x10x10x8xf32, #tpu.memory_space<vmem>>, vector<2x10x1x8xf32>,
    %c0_29 = arith.constant 0 : index
    %c0_30 = arith.constant 0 : index
    %c9_31 = arith.constant 9 : index
    %c0_32 = arith.constant 0 : index
    %11 = vector.load %arg8[%c0_29, %c0_30, %c9_31, %c0_32] : memref<2x10x10x8xf32, #tpu.memory_space<vmem>>, vector<2x10x1x8xf32>
    tpu.vector_store %arg8[%c0_29, %c0_30, %c9_31, %c0_32], %7 {strides = array<i32>} : memref<2x10x10x8xf32, #tpu.memory_space<vmem>>, vector<2x10x1x8xf32>,
    %c0_33 = arith.constant 0 : index
    %c0_34 = arith.constant 0 : index
    %c0_35 = arith.constant 0 : index
    %c0_36 = arith.constant 0 : index
    %12 = vector.load %arg1[%c0_33, %c0_34, %c0_35, %c0_36] : memref<2x16x8x8xbf16, #tpu.memory_space<vmem>>, vector<2x16x8x8xbf16>
    %13 = arith.extf %12 : vector<2x16x8x8xbf16> to vector<2x16x8x8xf32>
    %14 = vector.shape_cast %13 : vector<2x16x8x8xf32> to vector<16x2x8x8xf32>
    %cst_37 = arith.constant dense<0xFF800000> : vector<16x8x8xf32>
    %15 = vector.multi_reduction <maximumf>, %14, %cst_37 [1] : vector<16x2x8x8xf32> to vector<16x8x8xf32>
    %16 = vector.extract_strided_slice %15 {offsets = [0, 0, 0], sizes = [16, 8, 4], strides = [1, 1, 1]} : vector<16x8x8xf32> to vector<16x8x4xf32>
    %17 = vector.extract_strided_slice %15 {offsets = [0, 0, 4], sizes = [16, 8, 4], strides = [1, 1, 1]} : vector<16x8x8xf32> to vector<16x8x4xf32>
    %18 = arith.maximumf %16, %17 : vector<16x8x4xf32>
    %19 = vector.shape_cast %18 : vector<16x8x4xf32> to vector<2x8x8x4xf32>
    %c0_38 = arith.constant 0 : index
    %c1 = arith.constant 1 : index
    %c1_39 = arith.constant 1 : index
    %c0_40 = arith.constant 0 : index
    %20 = vector.load %arg7[%c0_38, %c1, %c1_39, %c0_40] : memref<2x10x10x4xf32, #tpu.memory_space<vmem>>, vector<2x8x8x4xf32>
    tpu.vector_store %arg7[%c0_38, %c1, %c1_39, %c0_40], %19 {strides = array<i32>} : memref<2x10x10x4xf32, #tpu.memory_space<vmem>>, vector<2x8x8x4xf32>,
    %c0_41 = arith.constant 0 : index
    %c0_42 = arith.constant 0 : index
    %c0_43 = arith.constant 0 : index
    %c0_44 = arith.constant 0 : index
    %21 = vector.load %arg7[%c0_41, %c0_42, %c0_43, %c0_44] : memref<2x10x10x4xf32, #tpu.memory_space<vmem>>, vector<2x8x8x4xf32>
    %22 = vector.shape_cast %21 : vector<2x8x8x4xf32> to vector<128x4xf32>
    %c0_45 = arith.constant 0 : index
    %c0_46 = arith.constant 0 : index
    %c1_47 = arith.constant 1 : index
    %c0_48 = arith.constant 0 : index
    %23 = vector.load %arg7[%c0_45, %c0_46, %c1_47, %c0_48] : memref<2x10x10x4xf32, #tpu.memory_space<vmem>>, vector<2x8x8x4xf32>
    %24 = vector.shape_cast %23 : vector<2x8x8x4xf32> to vector<128x4xf32>
    %c0_49 = arith.constant 0 : index
    %c0_50 = arith.constant 0 : index
    %c2 = arith.constant 2 : index
    %c0_51 = arith.constant 0 : index
    %25 = vector.load %arg7[%c0_49, %c0_50, %c2, %c0_51] : memref<2x10x10x4xf32, #tpu.memory_space<vmem>>, vector<2x8x8x4xf32>
    %26 = vector.shape_cast %25 : vector<2x8x8x4xf32> to vector<128x4xf32>
    %c0_52 = arith.constant 0 : index
    %c1_53 = arith.constant 1 : index
    %c0_54 = arith.constant 0 : index
    %c0_55 = arith.constant 0 : index
    %27 = vector.load %arg7[%c0_52, %c1_53, %c0_54, %c0_55] : memref<2x10x10x4xf32, #tpu.memory_space<vmem>>, vector<2x8x8x4xf32>
    %28 = vector.shape_cast %27 : vector<2x8x8x4xf32> to vector<128x4xf32>
    %c0_56 = arith.constant 0 : index
    %c1_57 = arith.constant 1 : index
    %c1_58 = arith.constant 1 : index
    %c0_59 = arith.constant 0 : index
    %29 = vector.load %arg7[%c0_56, %c1_57, %c1_58, %c0_59] : memref<2x10x10x4xf32, #tpu.memory_space<vmem>>, vector<2x8x8x4xf32>
    %30 = vector.shape_cast %29 : vector<2x8x8x4xf32> to vector<128x4xf32>
    %c0_60 = arith.constant 0 : index
    %c1_61 = arith.constant 1 : index
    %c2_62 = arith.constant 2 : index
    %c0_63 = arith.constant 0 : index
    %31 = vector.load %arg7[%c0_60, %c1_61, %c2_62, %c0_63] : memref<2x10x10x4xf32, #tpu.memory_space<vmem>>, vector<2x8x8x4xf32>
    %32 = vector.shape_cast %31 : vector<2x8x8x4xf32> to vector<128x4xf32>
    %c0_64 = arith.constant 0 : index
    %c2_65 = arith.constant 2 : index
    %c0_66 = arith.constant 0 : index
    %c0_67 = arith.constant 0 : index
    %33 = vector.load %arg7[%c0_64, %c2_65, %c0_66, %c0_67] : memref<2x10x10x4xf32, #tpu.memory_space<vmem>>, vector<2x8x8x4xf32>
    %34 = vector.shape_cast %33 : vector<2x8x8x4xf32> to vector<128x4xf32>
    %c0_68 = arith.constant 0 : index
    %c2_69 = arith.constant 2 : index
    %c1_70 = arith.constant 1 : index
    %c0_71 = arith.constant 0 : index
    %35 = vector.load %arg7[%c0_68, %c2_69, %c1_70, %c0_71] : memref<2x10x10x4xf32, #tpu.memory_space<vmem>>, vector<2x8x8x4xf32>
    %36 = vector.shape_cast %35 : vector<2x8x8x4xf32> to vector<128x4xf32>
    %c0_72 = arith.constant 0 : index
    %c2_73 = arith.constant 2 : index
    %c2_74 = arith.constant 2 : index
    %c0_75 = arith.constant 0 : index
    %37 = vector.load %arg7[%c0_72, %c2_73, %c2_74, %c0_75] : memref<2x10x10x4xf32, #tpu.memory_space<vmem>>, vector<2x8x8x4xf32>
    %38 = vector.shape_cast %37 : vector<2x8x8x4xf32> to vector<128x4xf32>
    %39 = tpu.concatenate %22, %24, %26, %28, %30, %32, %34, %36, %38 in 1 : vector<128x4xf32>, vector<128x4xf32>, vector<128x4xf32>, vector<128x4xf32>, vector<128x4xf32>, vector<128x4xf32>, vector<128x4xf32>, vector<128x4xf32>, vector<128x4xf32> -> vector<128x36xf32>
    %40 = arith.truncf %39 : vector<128x36xf32> to vector<128x36xbf16>
    %c0_76 = arith.constant 0 : index
    %c0_77 = arith.constant 0 : index
    %41 = vector.load %arg2[%c0_76, %c0_77] : memref<36x8xbf16, #tpu.memory_space<vmem>>, vector<36x8xbf16>
    %cst_78 = arith.constant dense<0.000000e+00> : vector<128x8xf32>
    %42 = tpu.matmul %40, %41, %cst_78 {dimension_numbers = #tpu.dot_dimension_numbers<[1], [0], [0], [1], [0, 0, 1, 1], [], []>} : vector<128x36xbf16>, vector<36x8xbf16>, vector<128x8xf32> -> vector<128x8xf32>
    %c0_79 = arith.constant 0 : index
    %c0_80 = arith.constant 0 : index
    %43 = vector.load %arg3[%c0_79, %c0_80] : memref<1x8xf32, #tpu.memory_space<vmem>>, vector<1x8xf32>
    %44 = vector.broadcast %43 : vector<1x8xf32> to vector<128x8xf32>
    %45 = arith.addf %42, %44 : vector<128x8xf32>
    %cst_81 = arith.constant 0.000000e+00 : f32
    %46 = vector.broadcast %cst_81 : f32 to vector<128x8xf32>
    %47 = arith.maximumf %45, %46 : vector<128x8xf32>
    %48 = vector.shape_cast %47 : vector<128x8xf32> to vector<2x8x8x8xf32>
    %c0_82 = arith.constant 0 : index
    %c1_83 = arith.constant 1 : index
    %c1_84 = arith.constant 1 : index
    %c0_85 = arith.constant 0 : index
    %49 = vector.load %arg8[%c0_82, %c1_83, %c1_84, %c0_85] : memref<2x10x10x8xf32, #tpu.memory_space<vmem>>, vector<2x8x8x8xf32>
    tpu.vector_store %arg8[%c0_82, %c1_83, %c1_84, %c0_85], %48 {strides = array<i32>} : memref<2x10x10x8xf32, #tpu.memory_space<vmem>>, vector<2x8x8x8xf32>,
    %c0_86 = arith.constant 0 : index
    %c0_87 = arith.constant 0 : index
    %c0_88 = arith.constant 0 : index
    %c0_89 = arith.constant 0 : index
    %50 = vector.load %arg8[%c0_86, %c0_87, %c0_88, %c0_89] : memref<2x10x10x8xf32, #tpu.memory_space<vmem>>, vector<2x8x8x8xf32>
    %51 = vector.shape_cast %50 : vector<2x8x8x8xf32> to vector<128x8xf32>
    %c0_90 = arith.constant 0 : index
    %c0_91 = arith.constant 0 : index
    %c1_92 = arith.constant 1 : index
    %c0_93 = arith.constant 0 : index
    %52 = vector.load %arg8[%c0_90, %c0_91, %c1_92, %c0_93] : memref<2x10x10x8xf32, #tpu.memory_space<vmem>>, vector<2x8x8x8xf32>
    %53 = vector.shape_cast %52 : vector<2x8x8x8xf32> to vector<128x8xf32>
    %c0_94 = arith.constant 0 : index
    %c0_95 = arith.constant 0 : index
    %c2_96 = arith.constant 2 : index
    %c0_97 = arith.constant 0 : index
    %54 = vector.load %arg8[%c0_94, %c0_95, %c2_96, %c0_97] : memref<2x10x10x8xf32, #tpu.memory_space<vmem>>, vector<2x8x8x8xf32>
    %55 = vector.shape_cast %54 : vector<2x8x8x8xf32> to vector<128x8xf32>
    %c0_98 = arith.constant 0 : index
    %c1_99 = arith.constant 1 : index
    %c0_100 = arith.constant 0 : index
    %c0_101 = arith.constant 0 : index
    %56 = vector.load %arg8[%c0_98, %c1_99, %c0_100, %c0_101] : memref<2x10x10x8xf32, #tpu.memory_space<vmem>>, vector<2x8x8x8xf32>
    %57 = vector.shape_cast %56 : vector<2x8x8x8xf32> to vector<128x8xf32>
    %c0_102 = arith.constant 0 : index
    %c1_103 = arith.constant 1 : index
    %c1_104 = arith.constant 1 : index
    %c0_105 = arith.constant 0 : index
    %58 = vector.load %arg8[%c0_102, %c1_103, %c1_104, %c0_105] : memref<2x10x10x8xf32, #tpu.memory_space<vmem>>, vector<2x8x8x8xf32>
    %59 = vector.shape_cast %58 : vector<2x8x8x8xf32> to vector<128x8xf32>
    %c0_106 = arith.constant 0 : index
    %c1_107 = arith.constant 1 : index
    %c2_108 = arith.constant 2 : index
    %c0_109 = arith.constant 0 : index
    %60 = vector.load %arg8[%c0_106, %c1_107, %c2_108, %c0_109] : memref<2x10x10x8xf32, #tpu.memory_space<vmem>>, vector<2x8x8x8xf32>
    %61 = vector.shape_cast %60 : vector<2x8x8x8xf32> to vector<128x8xf32>
    %c0_110 = arith.constant 0 : index
    %c2_111 = arith.constant 2 : index
    %c0_112 = arith.constant 0 : index
    %c0_113 = arith.constant 0 : index
    %62 = vector.load %arg8[%c0_110, %c2_111, %c0_112, %c0_113] : memref<2x10x10x8xf32, #tpu.memory_space<vmem>>, vector<2x8x8x8xf32>
    %63 = vector.shape_cast %62 : vector<2x8x8x8xf32> to vector<128x8xf32>
    %c0_114 = arith.constant 0 : index
    %c2_115 = arith.constant 2 : index
    %c1_116 = arith.constant 1 : index
    %c0_117 = arith.constant 0 : index
    %64 = vector.load %arg8[%c0_114, %c2_115, %c1_116, %c0_117] : memref<2x10x10x8xf32, #tpu.memory_space<vmem>>, vector<2x8x8x8xf32>
    %65 = vector.shape_cast %64 : vector<2x8x8x8xf32> to vector<128x8xf32>
    %c0_118 = arith.constant 0 : index
    %c2_119 = arith.constant 2 : index
    %c2_120 = arith.constant 2 : index
    %c0_121 = arith.constant 0 : index
    %66 = vector.load %arg8[%c0_118, %c2_119, %c2_120, %c0_121] : memref<2x10x10x8xf32, #tpu.memory_space<vmem>>, vector<2x8x8x8xf32>
    %67 = vector.shape_cast %66 : vector<2x8x8x8xf32> to vector<128x8xf32>
    %68 = tpu.concatenate %51, %53, %55, %57, %59, %61, %63, %65, %67 in 1 : vector<128x8xf32>, vector<128x8xf32>, vector<128x8xf32>, vector<128x8xf32>, vector<128x8xf32>, vector<128x8xf32>, vector<128x8xf32>, vector<128x8xf32>, vector<128x8xf32> -> vector<128x72xf32>
    %69 = arith.truncf %68 : vector<128x72xf32> to vector<128x72xbf16>
    %c0_122 = arith.constant 0 : index
    %c0_123 = arith.constant 0 : index
    %70 = vector.load %arg4[%c0_122, %c0_123] : memref<72x8xbf16, #tpu.memory_space<vmem>>, vector<72x8xbf16>
    %cst_124 = arith.constant dense<0.000000e+00> : vector<128x8xf32>
    %71 = tpu.matmul %69, %70, %cst_124 {dimension_numbers = #tpu.dot_dimension_numbers<[1], [0], [0], [1], [0, 0, 1, 1], [], []>} : vector<128x72xbf16>, vector<72x8xbf16>, vector<128x8xf32> -> vector<128x8xf32>
    %c0_125 = arith.constant 0 : index
    %c0_126 = arith.constant 0 : index
    %72 = vector.load %arg5[%c0_125, %c0_126] : memref<1x8xf32, #tpu.memory_space<vmem>>, vector<1x8xf32>
    %73 = vector.broadcast %72 : vector<1x8xf32> to vector<128x8xf32>
    %74 = arith.addf %71, %73 : vector<128x8xf32>
    %cst_127 = arith.constant 0.000000e+00 : f32
    %75 = vector.broadcast %cst_127 : f32 to vector<128x8xf32>
    %76 = arith.maximumf %74, %75 : vector<128x8xf32>
    %77 = vector.shape_cast %76 : vector<128x8xf32> to vector<2x8x8x8xf32>
    %c0_128 = arith.constant 0 : index
    %c0_129 = arith.constant 0 : index
    %c0_130 = arith.constant 0 : index
    %c0_131 = arith.constant 0 : index
    %78 = vector.load %arg6[%c0_128, %c0_129, %c0_130, %c0_131] : memref<2x8x8x8xf32, #tpu.memory_space<vmem>>, vector<2x8x8x8xf32>
    tpu.vector_store %arg6[%c0_128, %c0_129, %c0_130, %c0_131], %77 {strides = array<i32>} : memref<2x8x8x8xf32, #tpu.memory_space<vmem>>, vector<2x8x8x8xf32>,
    return
  }
  func.func @transform_0(%arg0: i32) -> (i32, i32, i32, i32) {
    %c0_i32 = arith.constant 0 : i32
    %c0_i32_0 = arith.constant 0 : i32
    %c0_i32_1 = arith.constant 0 : i32
    %c0_i32_2 = arith.constant 0 : i32
    return %arg0, %c0_i32, %c0_i32_0, %c0_i32_1 : i32, i32, i32, i32
  }
  func.func @transform_1(%arg0: i32) -> (i32, i32) {
    %c0_i32 = arith.constant 0 : i32
    %c0_i32_0 = arith.constant 0 : i32
    %c0_i32_1 = arith.constant 0 : i32
    return %c0_i32, %c0_i32_0 : i32, i32
  }
  func.func @transform_2(%arg0: i32) -> (i32, i32) {
    %c0_i32 = arith.constant 0 : i32
    %c0_i32_0 = arith.constant 0 : i32
    %c0_i32_1 = arith.constant 0 : i32
    return %c0_i32, %c0_i32_0 : i32, i32
  }
  func.func @transform_3(%arg0: i32) -> (i32, i32) {
    %c0_i32 = arith.constant 0 : i32
    %c0_i32_0 = arith.constant 0 : i32
    %c0_i32_1 = arith.constant 0 : i32
    return %c0_i32, %c0_i32_0 : i32, i32
  }
  func.func @transform_4(%arg0: i32) -> (i32, i32) {
    %c0_i32 = arith.constant 0 : i32
    %c0_i32_0 = arith.constant 0 : i32
    %c0_i32_1 = arith.constant 0 : i32
    return %c0_i32, %c0_i32_0 : i32, i32
  }
  func.func @transform_5(%arg0: i32) -> (i32, i32, i32, i32) {
    %c0_i32 = arith.constant 0 : i32
    %c0_i32_0 = arith.constant 0 : i32
    %c0_i32_1 = arith.constant 0 : i32
    %c0_i32_2 = arith.constant 0 : i32
    return %arg0, %c0_i32, %c0_i32_0, %c0_i32_1 : i32, i32, i32, i32
  }
}

</mosaic_0001>

<bundles_post_ra>
// kernel: tpu_custom_call.1
= control target key start
LH: loop header
LB: loop body
LE: loop exit
PB: predicated region body
PF: predicated region fallthrough
CT: control target
= control target key end

     0   :  { %vm74_vm0 = vcmask 64512   ;;  %s3241_s13 = smov 124   ;;  %vm22_vm1 = vcmask 31744   ;;  %s4320_s0 = inlined_call_operand.vmem [shape: bf16[2,16,8,8], index: 0, kind: input, shape index: {}]   ;;  %s4321_s1 = inlined_call_operand.vmem [shape: bf16[36,8], index: 1, kind: input, shape index: {}]   ;;  %s4322_s2 = inlined_call_operand.vmem [shape: f32[1,8], index: 2, kind: input, shape index: {}]   ;;  %s4323_s3 = inlined_call_operand.vmem [shape: bf16[72,8], index: 3, kind: input, shape index: {}]   ;;  %s4324_s4 = inlined_call_operand.vmem [shape: f32[1,8], index: 4, kind: input, shape index: {}]   ;;  %s4325_s5 = inlined_call_operand.hbm [shape: f32[2,8,8,8], index: 5, kind: output, shape index: {}]  }
   0x1   :  { %v2361_v0 = vld [vmem:[%s4320_s0] sm:$0xff]   ;;  %v2424_v1 = vld [vmem:[%s4320_s0 + $0x8] sm:$0xff]   ;;  %v2425_v12 = vld [vmem:[%s4320_s0 + $0x10] sm:$0xff]  }
   0x2   :  { %v2427_v2 = vld [vmem:[%s4320_s0 + $0x20] sm:$0xff]   ;;  %v2362_v3 = vunpack.c.l.bf16 %v2361_v0  ;;  %v2363_v4 = vunpack.c.h.bf16 %v2361_v0  ;;  %v2366_v5 = vunpack.c.l.bf16 %v2424_v1  ;;  %v2367_v6 = vunpack.c.h.bf16 %v2424_v1  ;;  %v2428_v7 = vld [vmem:[%s4320_s0 + $0x28] sm:$0xff]   ;;  %v2426_v17 = vld [vmem:[%s4320_s0 + $0x18] sm:$0xff]  }
   0x3   :  { %v2378_v8 = vunpack.c.l.bf16 %v2427_v2  ;;  %v2379_v9 = vunpack.c.h.bf16 %v2427_v2  ;;  %v2382_v10 = vunpack.c.l.bf16 %v2428_v7  ;;  %v2383_v11 = vunpack.c.h.bf16 %v2428_v7  ;;  %v2429_v22 = vld [vmem:[%s4320_s0 + $0x30] sm:$0xff]   ;;  %v2430_v27 = vld [vmem:[%s4320_s0 + $0x38] sm:$0xff]   ;;  %v2431_v42 = vld [vmem:[%s4320_s0 + $0x40] sm:$0xff]  }
   0x4   :  { %v190_v13 = vsel %vm74_vm0, %v2362_v3, -inf  ;;  %v191_v14 = vsel %vm74_vm0, %v2363_v4, -inf  ;;  %v193_v15 = vsel %vm74_vm0, %v2366_v5, -inf  ;;  %v194_v16 = vsel %vm74_vm0, %v2367_v6, -inf  ;;  %v2433_v32 = vld [vmem:[%s4320_s0 + $0x50] sm:$0xff]   ;;  %v2434_v37 = vld [vmem:[%s4320_s0 + $0x58] sm:$0xff]  }
   0x5   :  { %v3309_v18 = vmax.f32 %v190_v13, %v191_v14  ;;  %v3311_v19 = vmax.f32 %v193_v15, %v194_v16  ;;  %v202_v20 = vsel %vm74_vm0, %v2378_v8, -inf  ;;  %v203_v21 = vsel %vm74_vm0, %v2379_v9, -inf  ;;  %v2432_v55 = vld [vmem:[%s4320_s0 + $0x48] sm:$0xff]  }
   0x6   :  { %v3318_v23 = vmax.f32 %v202_v20, %v203_v21  ;;  %v205_v24 = vsel %vm74_vm0, %v2382_v10, -inf  ;;  %v206_v25 = vsel %vm74_vm0, %v2383_v11, -inf  ;;  %v2370_v26 = vunpack.c.l.bf16 %v2425_v12 }
   0x7   :  { %v2529_v28 = vpack.i.bf16 %v3311_v19, %v3309_v18  ;;  %v3327_v29 = vmax.f32 %v205_v24, %v206_v25  ;;  %v2371_v30 = vunpack.c.h.bf16 %v2425_v12  ;;  %v2374_v31 = vunpack.c.l.bf16 %v2426_v17 }
   0x8   :  { %v2375_v33 = vunpack.c.h.bf16 %v2426_v17  ;;  %v196_v34 = vsel %vm74_vm0, %v2370_v26, -inf  ;;  %v2386_v35 = vunpack.c.l.bf16 %v2429_v22  ;;  %v2387_v36 = vunpack.c.h.bf16 %v2429_v22 }
   0x9   :  { %2530 = vrot.lane.b32.xlu0 %v2529_v28, %s3241_s13  ;;  %v2539_v38 = vpack.i.bf16 %v3327_v29, %v3318_v23  ;;  %v197_v39 = vsel %vm74_vm0, %v2371_v30, -inf  ;;  %v199_v40 = vsel %vm74_vm0, %v2374_v31, -inf  ;;  %v2390_v41 = vunpack.c.l.bf16 %v2430_v27 }
   0xa   :  { %v3344_v43 = vmax.f32 %v196_v34, %v197_v39  ;;  %v200_v44 = vsel %vm74_vm0, %v2375_v33, -inf  ;;  %v2391_v45 = vunpack.c.h.bf16 %v2430_v27  ;;  %v208_v46 = vsel %vm74_vm0, %v2386_v35, -inf }
   0xb   :  { %2540 = vrot.lane.b32.xlu1 %v2539_v38, %s3241_s13  ;;  %v3349_v47 = vmax.f32 %v199_v40, %v200_v44  ;;  %v209_v48 = vsel %vm74_vm0, %v2387_v36, -inf  ;;  %v211_v49 = vsel %vm74_vm0, %v2390_v41, -inf  ;;  %v2402_v50 = vunpack.c.l.bf16 %v2433_v32 }
   0xc   :  { %v3353_v51 = vmax.f32 %v208_v46, %v209_v48  ;;  %v212_v52 = vsel %vm74_vm0, %v2391_v45, -inf  ;;  %v2403_v53 = vunpack.c.h.bf16 %v2433_v32  ;;  %v2406_v54 = vunpack.c.l.bf16 %v2434_v37 }
   0xd   :  { %v2534_v56 = vpack.i.bf16 %v3349_v47, %v3344_v43  ;;  %v3361_v57 = vmax.f32 %v211_v49, %v212_v52  ;;  %v2407_v58 = vunpack.c.h.bf16 %v2434_v37  ;;  %v220_v59 = vsel %vm74_vm0, %v2402_v50, -inf }
   0xe   :  { %10 = vsyncpa [#allocation5], 0  ;;  %v221_v60 = vsel %vm74_vm0, %v2403_v53, -inf  ;;  %v223_v61 = vsel %vm74_vm0, %v2406_v54, -inf  ;;  %v2394_v62 = vunpack.c.l.bf16 %v2431_v42  ;;  %v2395_v63 = vunpack.c.h.bf16 %v2431_v42  ;;  %v2435_v0 = vld [vmem:[%s4320_s0 + $0x60] sm:$0xff]   ;;  %v2436_v5 = vld [vmem:[%s4320_s0 + $0x68] sm:$0xff]  }
   0xf   :  { %2535 = vrot.lane.b32.xlu0 %v2534_v56, %s3241_s13  ;;  %v2544_v1 = vpack.i.bf16 %v3361_v57, %v3353_v51  ;;  %v3372_v2 = vmax.f32 %v220_v59, %v221_v60  ;;  %v224_v3 = vsel %vm74_vm0, %v2407_v58, -inf  ;;  %v2398_v4 = vunpack.c.l.bf16 %v2432_v55  ;;  %v2437_v10 = vld [vmem:[%s4320_s0 + $0x70] sm:$0xff]   ;;  %v2438_v21 = vld [vmem:[%s4320_s0 + $0x78] sm:$0xff]   ;;  %s3243_s0 = smov 4   ;;  %s3244_s26 = smov 8  }
  0x10   :  { %v3378_v6 = vmax.f32 %v223_v61, %v224_v3  ;;  %v2399_v7 = vunpack.c.h.bf16 %v2432_v55  ;;  %v214_v8 = vsel %vm74_vm0, %v2394_v62, -inf  ;;  %v215_v9 = vsel %vm74_vm0, %v2395_v63, -inf  ;;  %s3245_s27 = smov 12   ;;  %s3246_s28 = smov 16  }
  0x11   :  { %2545 = vrot.lane.b32.xlu1 %v2544_v1, %s3241_s13  ;;  %v3386_v11 = vmax.f32 %v214_v8, %v215_v9  ;;  %v217_v12 = vsel %vm74_vm0, %v2398_v4, -inf  ;;  %v2410_v13 = vunpack.c.l.bf16 %v2435_v0  ;;  %v2411_v14 = vunpack.c.h.bf16 %v2435_v0  ;;  %s3247_s6 = smov 20   ;;  %s3248_s9 = smov 24  }
  0x12   :  { %v2554_v15 = vpack.i.bf16 %v3378_v6, %v3372_v2  ;;  %v218_v16 = vsel %vm74_vm0, %v2399_v7, -inf  ;;  %v2414_v17 = vunpack.c.l.bf16 %v2436_v5  ;;  %v2415_v20 = vunpack.c.h.bf16 %v2436_v5  ;;  %s3249_s12 = smov 28   ;;  %s3252_s21 = smov 48  }
  0x13   :  { %v3395_v22 = vmax.f32 %v217_v12, %v218_v16  ;;  %v226_v24 = vsel %vm74_vm0, %v2410_v13, -inf  ;;  %v227_v25 = vsel %vm74_vm0, %v2411_v14, -inf  ;;  %v2418_v26 = vunpack.c.l.bf16 %v2437_v10  ;;  %s3253_s24 = smov 56  }
  0x14   :  { %v3399_v27 = vmax.f32 %v226_v24, %v227_v25  ;;  %v229_v28 = vsel %vm74_vm0, %v2414_v17, -inf  ;;  %v230_v30 = vsel %vm74_vm0, %v2415_v20, -inf  ;;  %v2419_v31 = vunpack.c.h.bf16 %v2437_v10 }
  0x15   :  { %2555 = vrot.lane.b32.xlu1 %v2554_v15, %s3241_s13  ;;  %v2549_v32 = vpack.i.bf16 %v3395_v22, %v3386_v11  ;;  %v3406_v33 = vmax.f32 %v229_v28, %v230_v30  ;;  %v2422_v34 = vunpack.c.l.bf16 %v2438_v21  ;;  %v2423_v35 = vunpack.c.h.bf16 %v2438_v21 }
  0x16   :  { %v232_v36 = vsel %vm74_vm0, %v2418_v26, -inf  ;;  %v233_v37 = vsel %vm74_vm0, %v2419_v31, -inf  ;;  %vm24_vm2 = vcmask 25600   ;;  %v3242_v42 = vmov 0.0  }
  0x17   :  { %2550 = vrot.lane.b32.xlu0 %v2549_v32, %s3241_s13  ;;  %v2559_v38 = vpack.i.bf16 %v3406_v33, %v3399_v27  ;;  %v3413_v39 = vmax.f32 %v232_v36, %v233_v37  ;;  %v235_v40 = vsel %vm74_vm0, %v2422_v34, -inf  ;;  %v236_v41 = vsel %vm74_vm0, %v2423_v35, -inf  ;;  %23 = vst.msk [vmem:[#allocation2] sm:$0xff] %vm22_vm1, %v3242_v42  ;;  %26 = vst.msk [vmem:[#allocation2 + $0xa0] sm:$0xff] %vm22_vm1, %v3242_v42 }
  0x18   :  { %25 = vst.msk [vmem:[#allocation2 + $0x8] sm:$0x3] %vm24_vm2, %v3242_v42  ;;  %27 = vst.msk [vmem:[#allocation2 + $0xa8] sm:$0x3] %vm24_vm2, %v3242_v42  ;;  %v3437_v44 = vmax.f32 %v235_v40, %v236_v41  ;;  %vm33_vm3 = vcmask 24576   ;;  %vm1186_vm4 = vcmask 1041408  }
  0x19   :  { %29 = vst.msk [vmem:[#allocation2 + $0x90] sm:$0xff] %vm22_vm1, %v3242_v42  ;;  %31 = vst.msk [vmem:[#allocation2 + $0x130] sm:$0xff] %vm22_vm1, %v3242_v42  ;;  %vm1024_vm5 = vcmask 97280   ;;  %vm1041_vm6 = vcmask 130048   ;;  %vm1058_vm7 = vcmask 162816   ;;  %vm1075_vm8 = vcmask 195584  }
  0x1a   :  { %30 = vst.msk [vmem:[#allocation2 + $0x98] sm:$0x3] %vm24_vm2, %v3242_v42  ;;  %32 = vst.msk [vmem:[#allocation2 + $0x138] sm:$0x3] %vm24_vm2, %v3242_v42  ;;  %v2564_v45 = vpack.i.bf16 %v3437_v44, %v3413_v39  ;;  %vm1092_vm9 = vcmask 228352   ;;  %vm1109_vm10 = vcmask 261120  }
  0x1b   :  { %75 = vst.msk [vmem:[#allocation3] sm:$0xff] %vm74_vm0, %v3242_v42  ;;  %78 = vst.msk [vmem:[#allocation3 + $0xa0] sm:$0xff] %vm74_vm0, %v3242_v42  ;;  %2560 = vrot.lane.b32.xlu0 %v2559_v38, %s3241_s13  ;;  %vm1161_vm11 = vcmask 293888   ;;  %vm76_vm12 = vcmask 58368   ;;  %vm85_vm13 = vcmask 57344   ;;  %vm2185_vm14 = vcmask 1043456  }
  0x1c   :  { %81 = vst.msk [vmem:[#allocation3 + $0x90] sm:$0xff] %vm74_vm0, %v3242_v42  ;;  %83 = vst.msk [vmem:[#allocation3 + $0x130] sm:$0xff] %vm74_vm0, %v3242_v42  ;;  %2565 = vrot.lane.b32.xlu1 %v2564_v45, %s3241_s13  ;;  %s3250_s13 = smov 32   ;;  %vm2041_vm15 = vcmask 326656   ;;  %vm2075_vm2 = vcmask 457728  }
  0x1d   :  { %34 = vst.msk [vmem:[#allocation2] sm:$0x1] %vm33_vm3, %v3242_v42  ;;  %35 = vst.msk [vmem:[#allocation2 + $0x10] sm:$0x1] %vm33_vm3, %v3242_v42 }
  0x1e   :  { %36 = vst.msk [vmem:[#allocation2 + $0x20] sm:$0x1] %vm33_vm3, %v3242_v42  ;;  %37 = vst.msk [vmem:[#allocation2 + $0x30] sm:$0x1] %vm33_vm3, %v3242_v42 }
  0x1f   :  { %38 = vst.msk [vmem:[#allocation2 + $0x40] sm:$0x1] %vm33_vm3, %v3242_v42  ;;  %39 = vst.msk [vmem:[#allocation2 + $0x50] sm:$0x1] %vm33_vm3, %v3242_v42  ;;  %v351_v1 = vld [vmem:[#allocation2 + $0x1] sm:$0xff] }
  0x20   :  { %40 = vst.msk [vmem:[#allocation2 + $0x60] sm:$0x1] %vm33_vm3, %v3242_v42  ;;  %41 = vst.msk [vmem:[#allocation2 + $0x70] sm:$0x1] %vm33_vm3, %v3242_v42 }
  0x21   :  { %42 = vst.msk [vmem:[#allocation2 + $0x80] sm:$0x1] %vm33_vm3, %v3242_v42  ;;  %45 = vst.msk [vmem:[#allocation2 + $0xb0] sm:$0x1] %vm33_vm3, %v3242_v42 }
  0x22   :  { %46 = vst.msk [vmem:[#allocation2 + $0xc0] sm:$0x1] %vm33_vm3, %v3242_v42  ;;  %47 = vst.msk [vmem:[#allocation2 + $0xd0] sm:$0x1] %vm33_vm3, %v3242_v42 }
  0x23   :  { %48 = vst.msk [vmem:[#allocation2 + $0xe0] sm:$0x1] %vm33_vm3, %v3242_v42  ;;  %49 = vst.msk [vmem:[#allocation2 + $0xf0] sm:$0x1] %vm33_vm3, %v3242_v42 }
  0x24   :  { %50 = vst.msk [vmem:[#allocation2 + $0x100] sm:$0x1] %vm33_vm3, %v3242_v42  ;;  %51 = vst.msk [vmem:[#allocation2 + $0x110] sm:$0x1] %vm33_vm3, %v3242_v42 }
  0x25   :  { %52 = vst.msk [vmem:[#allocation2 + $0x120] sm:$0x1] %vm33_vm3, %v3242_v42  ;;  %54 = vst.msk [vmem:[#allocation2 + $0x9] sm:$0x1] %vm33_vm3, %v3242_v42 }
  0x26   :  { %55 = vst.msk [vmem:[#allocation2 + $0x19] sm:$0x1] %vm33_vm3, %v3242_v42  ;;  %56 = vst.msk [vmem:[#allocation2 + $0x29] sm:$0x1] %vm33_vm3, %v3242_v42 }
  0x27   :  { %57 = vst.msk [vmem:[#allocation2 + $0x39] sm:$0x1] %vm33_vm3, %v3242_v42  ;;  %58 = vst.msk [vmem:[#allocation2 + $0x49] sm:$0x1] %vm33_vm3, %v3242_v42 }
  0x28   :  { %59 = vst.msk [vmem:[#allocation2 + $0x59] sm:$0x1] %vm33_vm3, %v3242_v42  ;;  %60 = vst.msk [vmem:[#allocation2 + $0x69] sm:$0x1] %vm33_vm3, %v3242_v42 }
  0x29   :  { %61 = vst.msk [vmem:[#allocation2 + $0x79] sm:$0x1] %vm33_vm3, %v3242_v42  ;;  %62 = vst.msk [vmem:[#allocation2 + $0x89] sm:$0x1] %vm33_vm3, %v3242_v42 }
  0x2a   :  { %65 = vst.msk [vmem:[#allocation2 + $0xb9] sm:$0x1] %vm33_vm3, %v3242_v42  ;;  %66 = vst.msk [vmem:[#allocation2 + $0xc9] sm:$0x1] %vm33_vm3, %v3242_v42 }
  0x2b   :  { %67 = vst.msk [vmem:[#allocation2 + $0xd9] sm:$0x1] %vm33_vm3, %v3242_v42  ;;  %68 = vst.msk [vmem:[#allocation2 + $0xe9] sm:$0x1] %vm33_vm3, %v3242_v42 }
  0x2c   :  { %69 = vst.msk [vmem:[#allocation2 + $0xf9] sm:$0x1] %vm33_vm3, %v3242_v42  ;;  %70 = vst.msk [vmem:[#allocation2 + $0x109] sm:$0x1] %vm33_vm3, %v3242_v42 }
  0x2d   :  { %71 = vst.msk [vmem:[#allocation2 + $0x119] sm:$0x1] %vm33_vm3, %v3242_v42  ;;  %72 = vst.msk [vmem:[#allocation2 + $0x129] sm:$0x1] %vm33_vm3, %v3242_v42 }
  0x2e   :  { %43 = vst.msk [vmem:[#allocation2 + $0x90] sm:$0x1] %vm33_vm3, %v3242_v42  ;;  %44 = vst.msk [vmem:[#allocation2 + $0xa0] sm:$0x1] %vm33_vm3, %v3242_v42 }
  0x2f   :  { %53 = vst.msk [vmem:[#allocation2 + $0x130] sm:$0x1] %vm33_vm3, %v3242_v42  ;;  %63 = vst.msk [vmem:[#allocation2 + $0x99] sm:$0x1] %vm33_vm3, %v3242_v42 }
  0x30   :  { %64 = vst.msk [vmem:[#allocation2 + $0xa9] sm:$0x1] %vm33_vm3, %v3242_v42  ;;  %73 = vst.msk [vmem:[#allocation2 + $0x139] sm:$0x1] %vm33_vm3, %v3242_v42  ;;  %vm2092_vm3 = vcmask 523264  }
  0x31   :  { %77 = vst.msk [vmem:[#allocation3 + $0x8] sm:$0x3] %vm76_vm12, %v3242_v42  ;;  %79 = vst.msk [vmem:[#allocation3 + $0xa8] sm:$0x3] %vm76_vm12, %v3242_v42 }
  0x32   :  { %82 = vst.msk [vmem:[#allocation3 + $0x98] sm:$0x3] %vm76_vm12, %v3242_v42  ;;  %84 = vst.msk [vmem:[#allocation3 + $0x138] sm:$0x3] %vm76_vm12, %v3242_v42 }
  0x33   :  { %89 = vst.msk [vmem:[#allocation3 + $0x30] sm:$0x1] %vm85_vm13, %v3242_v42  ;;  %90 = vst.msk [vmem:[#allocation3 + $0x40] sm:$0x1] %vm85_vm13, %v3242_v42 }
  0x34   :  { %86 = vst.msk [vmem:[#allocation3] sm:$0x1] %vm85_vm13, %v3242_v42  ;;  %87 = vst.msk [vmem:[#allocation3 + $0x10] sm:$0x1] %vm85_vm13, %v3242_v42 }
  0x35   :  { %88 = vst.msk [vmem:[#allocation3 + $0x20] sm:$0x1] %vm85_vm13, %v3242_v42  ;;  %91 = vst.msk [vmem:[#allocation3 + $0x50] sm:$0x1] %vm85_vm13, %v3242_v42 }
  0x36   :  { %92 = vst.msk [vmem:[#allocation3 + $0x60] sm:$0x1] %vm85_vm13, %v3242_v42  ;;  %93 = vst.msk [vmem:[#allocation3 + $0x70] sm:$0x1] %vm85_vm13, %v3242_v42 }
  0x37   :  { %94 = vst.msk [vmem:[#allocation3 + $0x80] sm:$0x1] %vm85_vm13, %v3242_v42  ;;  %95 = vst.msk [vmem:[#allocation3 + $0x90] sm:$0x1] %vm85_vm13, %v3242_v42 }
  0x38   :  { %96 = vst.msk [vmem:[#allocation3 + $0xa0] sm:$0x1] %vm85_vm13, %v3242_v42  ;;  %97 = vst.msk [vmem:[#allocation3 + $0xb0] sm:$0x1] %vm85_vm13, %v3242_v42 }
  0x39   :  { %98 = vst.msk [vmem:[#allocation3 + $0xc0] sm:$0x1] %vm85_vm13, %v3242_v42  ;;  %99 = vst.msk [vmem:[#allocation3 + $0xd0] sm:$0x1] %vm85_vm13, %v3242_v42 }
  0x3a   :  { %100 = vst.msk [vmem:[#allocation3 + $0xe0] sm:$0x1] %vm85_vm13, %v3242_v42  ;;  %101 = vst.msk [vmem:[#allocation3 + $0xf0] sm:$0x1] %vm85_vm13, %v3242_v42 }
  0x3b   :  { %102 = vst.msk [vmem:[#allocation3 + $0x100] sm:$0x1] %vm85_vm13, %v3242_v42  ;;  %103 = vst.msk [vmem:[#allocation3 + $0x110] sm:$0x1] %vm85_vm13, %v3242_v42 }
  0x3c   :  { %104 = vst.msk [vmem:[#allocation3 + $0x120] sm:$0x1] %vm85_vm13, %v3242_v42  ;;  %105 = vst.msk [vmem:[#allocation3 + $0x130] sm:$0x1] %vm85_vm13, %v3242_v42 }
  0x3d   :  { %107 = vst.msk [vmem:[#allocation3 + $0x19] sm:$0x1] %vm85_vm13, %v3242_v42  ;;  %108 = vst.msk [vmem:[#allocation3 + $0x29] sm:$0x1] %vm85_vm13, %v3242_v42 }
  0x3e   :  { %109 = vst.msk [vmem:[#allocation3 + $0x39] sm:$0x1] %vm85_vm13, %v3242_v42  ;;  %110 = vst.msk [vmem:[#allocation3 + $0x49] sm:$0x1] %vm85_vm13, %v3242_v42 }
  0x3f   :  { %111 = vst.msk [vmem:[#allocation3 + $0x59] sm:$0x1] %vm85_vm13, %v3242_v42  ;;  %112 = vst.msk [vmem:[#allocation3 + $0x69] sm:$0x1] %vm85_vm13, %v3242_v42 }
  0x40   :  { %113 = vst.msk [vmem:[#allocation3 + $0x79] sm:$0x1] %vm85_vm13, %v3242_v42  ;;  %114 = vst.msk [vmem:[#allocation3 + $0x89] sm:$0x1] %vm85_vm13, %v3242_v42 }
  0x41   :  { %117 = vst.msk [vmem:[#allocation3 + $0xb9] sm:$0x1] %vm85_vm13, %v3242_v42  ;;  %118 = vst.msk [vmem:[#allocation3 + $0xc9] sm:$0x1] %vm85_vm13, %v3242_v42 }
  0x42   :  { %119 = vst.msk [vmem:[#allocation3 + $0xd9] sm:$0x1] %vm85_vm13, %v3242_v42  ;;  %120 = vst.msk [vmem:[#allocation3 + $0xe9] sm:$0x1] %vm85_vm13, %v3242_v42 }
  0x43   :  { %121 = vst.msk [vmem:[#allocation3 + $0xf9] sm:$0x1] %vm85_vm13, %v3242_v42  ;;  %122 = vst.msk [vmem:[#allocation3 + $0x109] sm:$0x1] %vm85_vm13, %v3242_v42 }
  0x44   :  { %123 = vst.msk [vmem:[#allocation3 + $0x119] sm:$0x1] %vm85_vm13, %v3242_v42  ;;  %124 = vst.msk [vmem:[#allocation3 + $0x129] sm:$0x1] %vm85_vm13, %v3242_v42 }
  0x45   :  { %106 = vst.msk [vmem:[#allocation3 + $0x9] sm:$0x1] %vm85_vm13, %v3242_v42  ;;  %115 = vst.msk [vmem:[#allocation3 + $0x99] sm:$0x1] %vm85_vm13, %v3242_v42 }
  0x46   :  { %116 = vst.msk [vmem:[#allocation3 + $0xa9] sm:$0x1] %vm85_vm13, %v3242_v42  ;;  %125 = vst.msk [vmem:[#allocation3 + $0x139] sm:$0x1] %vm85_vm13, %v3242_v42 }
  0x7b   :  { %v2531_v46 = vpop.permute.xlu0 %2530 }
  0x7c   :  { %v2533_v48 = vunpack.i.h.bf16 %v2531_v46  ;;  %v2532_v49 = vunpack.i.l.bf16 %v2531_v46 }
  0x7d   :  { %v2541_v50 = vpop.permute.xlu1 %2540 }
  0x7e   :  { %v303_v52 = vmax.f32 %v3311_v19, %v2533_v48  ;;  %v302_v53 = vmax.f32 %v3309_v18, %v2532_v49  ;;  %v2543_v54 = vunpack.i.h.bf16 %v2541_v50  ;;  %v2542_v55 = vunpack.i.l.bf16 %v2541_v50  ;;  %v3210_v49 = vld [vmem:[%s4321_s1 + $0x8] sm:$0xff]  }
  0x80   :  { %319 = vst.msk [vmem:[#allocation2 + $0x11] sm:$0xff] %vm22_vm1, %v302_v53  ;;  %320 = vst.msk [vmem:[#allocation2 + $0x21] sm:$0xff] %vm22_vm1, %v303_v52  ;;  %v307_v56 = vmax.f32 %v3327_v29, %v2543_v54  ;;  %v306_v58 = vmax.f32 %v3318_v23, %v2542_v55  ;;  %v3211_v53 = vld [vmem:[%s4321_s1 + $0x10] ss:$0 sps:$4 sm:$0x33]  }
  0x81   :  { %v2536_v59 = vpop.permute.xlu0 %2535 }
  0x82   :  { %323 = vst.msk [vmem:[#allocation2 + $0x51] sm:$0xff] %vm22_vm1, %v306_v58  ;;  %324 = vst.msk [vmem:[#allocation2 + $0x61] sm:$0xff] %vm22_vm1, %v307_v56  ;;  %v2538_v60 = vunpack.i.h.bf16 %v2536_v59  ;;  %v2537_v61 = vunpack.i.l.bf16 %v2536_v59  ;;  %v1188_v56 = vsel %vm1186_vm4, %v3211_v53, 0 }
  0x83   :  { %v2546_v19 = vpop.permute.xlu1 %2545 }
  0x84   :  { %v305_v18 = vmax.f32 %v3349_v47, %v2538_v60  ;;  %v304_v62 = vmax.f32 %v3344_v43, %v2537_v61  ;;  %v2548_v63 = vunpack.i.h.bf16 %v2546_v19  ;;  %v2547_v0 = vunpack.i.l.bf16 %v2546_v19  ;;  %v367_v43 = vld [vmem:[#allocation2 + $0x2] sm:$0xff] }
  0x86   :  { %321 = vst.msk [vmem:[#allocation2 + $0x31] sm:$0xff] %vm22_vm1, %v304_v62  ;;  %322 = vst.msk [vmem:[#allocation2 + $0x41] sm:$0xff] %vm22_vm1, %v305_v18  ;;  %v309_v23 = vmax.f32 %v3361_v57, %v2548_v63  ;;  %v308_v29 = vmax.f32 %v3353_v51, %v2547_v0 }
  0x87   :  { %v352_v3 = vld [vmem:[#allocation2 + $0x11] sm:$0xff]  ;;  %v2556_v4 = vpop.permute.xlu1 %2555  ;;  %v353_v13 = vld [vmem:[#allocation2 + $0x21] sm:$0xff] }
  0x88   :  { %v2569_v5 = vpack.i.bf16 %v352_v3, %v351_v1  ;;  %325 = vst.msk [vmem:[#allocation2 + $0x71] sm:$0xff] %vm22_vm1, %v308_v29  ;;  %326 = vst.msk [vmem:[#allocation2 + $0x81] sm:$0xff] %vm22_vm1, %v309_v23  ;;  %v2558_v47 = vunpack.i.h.bf16 %v2556_v4  ;;  %v368_v7 = vld [vmem:[#allocation2 + $0x12] sm:$0xff]  ;;  %v2557_v8 = vunpack.i.l.bf16 %v2556_v4  ;;  %v3547_v21 = vld [vmem:[#allocation2 + $0x20] sm:$0xff]  ;;  %v2599_v37 = vpack.i.bf16 %v353_v13, %v352_v3 }
  0x89   :  { %v2551_v9 = vpop.permute.xlu0 %2550  ;;  %v2579_v14 = vpack.i.bf16 %v368_v7, %v367_v43  ;;  %v3545_v20 = vld [vmem:[#allocation2 + $0x10] sm:$0xff]  ;;  %v369_v26 = vld [vmem:[#allocation2 + $0x22] sm:$0xff] }
  0x8a   :  { %2570 = vrot.lane.b32.xlu0 %v2569_v5, %s3243_s0  ;;  %v313_v10 = vmax.f32 %v3378_v6, %v2558_v47  ;;  %v2553_v57 = vunpack.i.h.bf16 %v2551_v9  ;;  %v2552_v12 = vunpack.i.l.bf16 %v2551_v9  ;;  %v312_v51 = vmax.f32 %v3372_v2, %v2557_v8  ;;  %v3585_v52 = vld [vmem:[#allocation2 + $0x50] sm:$0xff]  ;;  %v357_v61 = vld [vmem:[#allocation2 + $0x61] sm:$0xff] }
  0x8b   :  { %v451_v55 = vld [vmem:[#allocation2 + $0x51] sm:$0xff]  ;;  %v3599_v18 = vld [vmem:[#allocation2 + $0x60] sm:$0xff] }
  0x8c   :  { %330 = vst.msk [vmem:[#allocation2 + $0xe1] sm:$0xff] %vm22_vm1, %v313_v10  ;;  %v311_v15 = vmax.f32 %v3395_v22, %v2553_v57  ;;  %v310_v16 = vmax.f32 %v3386_v11, %v2552_v12  ;;  %329 = vst.msk [vmem:[#allocation2 + $0xd1] sm:$0xff] %vm22_vm1, %v312_v51  ;;  %v2589_v11 = vpack.i.bf16 %v3547_v21, %v3545_v20  ;;  %v467_v58 = vld [vmem:[#allocation2 + $0x52] sm:$0xff]  ;;  %v373_v63 = vld [vmem:[#allocation2 + $0x62] sm:$0xff] }
  0x8d   :  { %v354_v17 = vld [vmem:[#allocation2 + $0x31] sm:$0xff]  ;;  %v2561_v6 = vpop.permute.xlu0 %2560  ;;  %v3560_v34 = vld [vmem:[#allocation2 + $0x40] sm:$0xff]  ;;  %v2669_v1 = vpack.i.bf16 %v3599_v18, %v3585_v52  ;;  %v2679_v3 = vpack.i.bf16 %v357_v61, %v451_v55  ;;  %v2689_v43 = vpack.i.bf16 %v373_v63, %v467_v58 }
  0x8e   :  { %v2574_v24 = vpack.i.bf16 %v354_v17, %v353_v13  ;;  %2580 = vrot.lane.b32.xlu0 %v2579_v14, %s3244_s26  ;;  %327 = vst.msk [vmem:[#allocation2 + $0xb1] sm:$0xff] %vm22_vm1, %v310_v16  ;;  %328 = vst.msk [vmem:[#allocation2 + $0xc1] sm:$0xff] %vm22_vm1, %v311_v15  ;;  %v2563_v2 = vunpack.i.h.bf16 %v2561_v6  ;;  %v370_v22 = vld [vmem:[#allocation2 + $0x32] sm:$0xff]  ;;  %v2566_v25 = vpop.permute.xlu1 %2565  ;;  %v2562_v31 = vunpack.i.l.bf16 %v2561_v6  ;;  %v402_v45 = vld [vmem:[#allocation2 + $0x41] sm:$0xff]  ;;  %v2624_v54 = vpack.i.bf16 %v3585_v52, %v3560_v34 }
  0x8f   :  { %v2584_v28 = vpack.i.bf16 %v370_v22, %v369_v26  ;;  %v3558_v32 = vld [vmem:[#allocation2 + $0x30] sm:$0xff]  ;;  %v2568_v35 = vunpack.i.h.bf16 %v2566_v25  ;;  %v2567_v36 = vunpack.i.l.bf16 %v2566_v25  ;;  %v418_v46 = vld [vmem:[#allocation2 + $0x42] sm:$0xff]  ;;  %v2634_v59 = vpack.i.bf16 %v451_v55, %v402_v45 }
  0x90   :  { %2575 = vrot.lane.b32.xlu1 %v2574_v24, %s3243_s0  ;;  %v315_v30 = vmax.f32 %v3406_v33, %v2563_v2  ;;  %v314_v38 = vmax.f32 %v3399_v27, %v2562_v31  ;;  %v2594_v33 = vpack.i.bf16 %v3560_v34, %v3558_v32  ;;  %v2609_v27 = vpack.i.bf16 %v369_v26, %v368_v7  ;;  %v358_v19 = vld [vmem:[#allocation2 + $0x71] sm:$0xff]  ;;  %v390_v29 = vld [vmem:[#allocation2 + $0x80] sm:$0xff] }
  0x91   :  { %v317_v40 = vmax.f32 %v3437_v44, %v2568_v35  ;;  %v316_v41 = vmax.f32 %v3413_v39, %v2567_v36  ;;  %v3209_v39 = vld [vmem:[%s4321_s1] sm:$0xff]   ;;  %v2604_v44 = vpack.i.bf16 %v402_v45, %v354_v17  ;;  %v2619_v48 = vpack.i.bf16 %v3558_v32, %v3547_v21  ;;  %v374_v0 = vld [vmem:[#allocation2 + $0x72] sm:$0xff] }
  0x92   :  { %2590 = vrot.lane.b32.xlu0 %v2589_v11, %s3245_s27  ;;  %332 = vst.msk [vmem:[#allocation2 + $0x101] sm:$0xff] %vm22_vm1, %v315_v30  ;;  %331 = vst.msk [vmem:[#allocation2 + $0xf1] sm:$0xff] %vm22_vm1, %v314_v38  ;;  %2463 = vmatprep.subr.bf16.mxu0 %v3209_v39  ;;  %v2614_v50 = vpack.i.bf16 %v418_v46, %v370_v22  ;;  %v2649_v60 = vpack.i.bf16 %v467_v58, %v418_v46  ;;  %v3607_v4 = vld [vmem:[#allocation2 + $0x70] sm:$0xff]  ;;  %v406_v47 = vld [vmem:[#allocation2 + $0x81] sm:$0xff] }
  0x93   :  { %333 = vst.msk [vmem:[#allocation2 + $0x111] sm:$0xff] %vm22_vm1, %v316_v41  ;;  %334 = vst.msk [vmem:[#allocation2 + $0x121] sm:$0xff] %vm22_vm1, %v317_v40  ;;  %2464 = vmatpush3.bf16.msra.mxu0 %v3209_v39  ;;  %v2654_v62 = vpack.i.bf16 %v358_v19, %v357_v61  ;;  %v2664_v23 = vpack.i.bf16 %v374_v0, %v373_v63  ;;  %v2674_v5 = vpack.i.bf16 %v390_v29, %v3607_v4  ;;  %v422_v8 = vld [vmem:[#allocation2 + $0x82] sm:$0xff]  ;;  %v439_v57 = vld [vmem:[#allocation2 + $0x90] sm:$0xff] }
  0x94   :  { %2585 = vrot.lane.b32.xlu1 %v2584_v28, %s3244_s26  ;;  %2465 = vmatprep.subr.bf16.mxu0 %v3210_v49  ;;  %v2684_v7 = vpack.i.bf16 %v406_v47, %v358_v19  ;;  %v2699_v9 = vpack.i.bf16 %v3607_v4, %v3599_v18  ;;  %v2694_v10 = vpack.i.bf16 %v422_v8, %v374_v0  ;;  %v455_v51 = vld [vmem:[#allocation2 + $0x91] sm:$0xff]  ;;  %v359_v13 = vld [vmem:[#allocation2 + $0xa1] sm:$0xff] }
  0x95   :  { %v2704_v12 = vpack.i.bf16 %v439_v57, %v390_v29  ;;  %v360_v14 = vld [vmem:[#allocation2 + $0xb1] sm:$0xff]  ;;  %v2714_v16 = vpack.i.bf16 %v455_v51, %v406_v47  ;;  %v361_v22 = vld [vmem:[#allocation2 + $0xc1] sm:$0xff] }
  0x96   :  { %2600 = vrot.lane.b32.xlu0 %v2599_v37, %s3246_s28  ;;  %v471_v15 = vld [vmem:[#allocation2 + $0x92] sm:$0xff]  ;;  %v2724_v17 = vpack.i.bf16 %v360_v14, %v359_v13  ;;  %v377_v31 = vld [vmem:[#allocation2 + $0xc2] sm:$0xff]  ;;  %v2759_v40 = vpack.i.bf16 %v361_v22, %v360_v14 }
  0x97   :  { %2466 = vmatpush3.bf16.msra.mxu0 %v3210_v49  ;;  %v2729_v6 = vpack.i.bf16 %v471_v15, %v422_v8  ;;  %v376_v2 = vld [vmem:[#allocation2 + $0xb2] sm:$0xff]  ;;  %v3633_v38 = vld [vmem:[#allocation2 + $0xe0] sm:$0xff] }
  0x98   :  { %2595 = vrot.lane.b32.xlu1 %v2594_v33, %s3245_s27  ;;  %2511 = vmatprep.subr.msk.bf16.mxu0 %vm1186_vm4, %v3211_v53  ;;  %v362_v11 = vld [vmem:[#allocation2 + $0xd1] sm:$0xff]  ;;  %v410_v45 = vld [vmem:[#allocation2 + $0xe1] sm:$0xff]  ;;  %vm2160_vm4 = vcmask 588800  }
  0x99   :  { %v3624_v26 = vld [vmem:[#allocation2 + $0xb0] sm:$0xff]  ;;  %v2734_v30 = vpack.i.bf16 %v362_v11, %v361_v22  ;;  %v2764_v39 = vpack.i.bf16 %v410_v45, %v362_v11  ;;  %v365_v58 = vld [vmem:[#allocation2 + $0x101] sm:$0xff] }
  0x9a   :  { %2610 = vrot.lane.b32.xlu0 %v2609_v27, %s3247_s6  ;;  %v378_v35 = vld [vmem:[#allocation2 + $0xd2] sm:$0xff]  ;;  %v2769_v27 = vpack.i.bf16 %v377_v31, %v376_v2  ;;  %v381_v19 = vld [vmem:[#allocation2 + $0x102] sm:$0xff] }
  0x9b   :  { %2468 = vmatpush3.bf16.msra.mxu0 %v1188_v56  ;;  %v2744_v37 = vpack.i.bf16 %v378_v35, %v377_v31  ;;  %v3636_v41 = vld [vmem:[#allocation2 + $0xd0] sm:$0xff]  ;;  %v335_v31 = vld [vmem:[#allocation2] sm:$0xff] }
  0x9c   :  { %2605 = vrot.lane.b32.xlu1 %v2604_v44, %s3246_s28  ;;  %v2754_v33 = vpack.i.bf16 %v3633_v38, %v3636_v41  ;;  %v426_v44 = vld [vmem:[#allocation2 + $0xe2] sm:$0xff]  ;;  %v3647_v49 = vld [vmem:[#allocation2 + $0xf0] sm:$0xff] }
  0x9d   :  { %v459_v53 = vld [vmem:[#allocation2 + $0xf1] sm:$0xff] }
  0x9e   :  { %2620 = vrot.lane.b32.xlu0 %v2619_v48, %s3248_s9  ;;  %v2774_v48 = vpack.i.bf16 %v426_v44, %v378_v35  ;;  %v2794_v55 = vpack.i.bf16 %v459_v53, %v410_v45  ;;  %v3666_v29 = vld [vmem:[#allocation2 + $0x110] sm:$0xff] }
  0x9f   :  { %v447_v57 = vld [vmem:[#allocation2 + $0x130] sm:$0xff] }
  0xa0   :  { %2615 = vrot.lane.b32.xlu1 %v2614_v50, %s3247_s6  ;;  %v2784_v50 = vpack.i.bf16 %v3647_v49, %v3633_v38  ;;  %v463_v14 = vld [vmem:[#allocation2 + $0x131] sm:$0xff] }
  0xa2   :  { %2630 = vrot.lane.b32.xlu0 %v2574_v24, %s3249_s12  ;;  %v375_v24 = vld [vmem:[#allocation2 + $0xa2] sm:$0xff] }
  0xa3   :  { %v2739_v25 = vpack.i.bf16 %v376_v2, %v375_v24 }
  0xa4   :  { %2625 = vrot.lane.b32.xlu1 %v2624_v54, %s3248_s9  ;;  %v475_v54 = vld [vmem:[#allocation2 + $0xf2] sm:$0xff] }
  0xa5   :  { %v2809_v56 = vpack.i.bf16 %v475_v54, %v426_v44  ;;  %v2849_v47 = vpack.i.bf16 %v381_v19, %v475_v54 }
  0xa6   :  { %2640 = vrot.lane.b32.xlu0 %v2584_v28, %s3250_s13  ;;  %v3626_v28 = vld [vmem:[#allocation2 + $0xc0] sm:$0xff] }
  0xa7   :  { %v2749_v36 = vpack.i.bf16 %v3626_v28, %v3624_v26  ;;  %v2779_v46 = vpack.i.bf16 %v3636_v41, %v3626_v28 }
  0xa8   :  { %2635 = vrot.lane.b32.xlu1 %v2634_v59, %s3249_s12 }
  0xaa   :  { %2650 = vrot.lane.b32.xlu0 %v2649_v60, %s3250_s13 }
  0xac   :  { %2645 = vrot.lane.b32.xlu1 %v2634_v59, %s3243_s0  ;;  %v366_v59 = vld [vmem:[#allocation2 + $0x111] sm:$0xff] }
  0xad   :  { %v2814_v61 = vpack.i.bf16 %v366_v59, %v365_v58 }
  0xae   :  { %2660 = vrot.lane.b32.xlu0 %v2649_v60, %s3244_s26  ;;  %v3658_v60 = vld [vmem:[#allocation2 + $0x100] sm:$0xff] }
  0xaf   :  { %v2829_v63 = vpack.i.bf16 %v3658_v60, %v3647_v49 }
  0xb0   :  { %2655 = vrot.lane.b32.xlu1 %v2654_v62, %s3243_s0 }
  0xb2   :  { %2670 = vrot.lane.b32.xlu0 %v2669_v1, %s3245_s27  ;;  %v398_v1 = vld [vmem:[#allocation2 + $0x120] sm:$0xff] }
  0xb3   :  { %v2864_v13 = vpack.i.bf16 %v447_v57, %v398_v1 }
  0xb4   :  { %2665 = vrot.lane.b32.xlu1 %v2664_v23, %s3244_s26 }
  0xb6   :  { %2680 = vrot.lane.b32.xlu0 %v2679_v3, %s3246_s28  ;;  %v2834_v3 = vpack.i.bf16 %v398_v1, %v3666_v29 }
  0xb8   :  { %2675 = vrot.lane.b32.xlu1 %v2674_v5, %s3245_s27  ;;  %v414_v5 = vld [vmem:[#allocation2 + $0x121] sm:$0xff] }
  0xba   :  { %2690 = vrot.lane.b32.xlu0 %v2689_v43, %s3247_s6  ;;  %v2844_v43 = vpack.i.bf16 %v414_v5, %v366_v59 }
  0xbc   :  { %2685 = vrot.lane.b32.xlu1 %v2684_v7, %s3246_s28  ;;  %v430_v7 = vld [vmem:[#allocation2 + $0x122] sm:$0xff] }
  0xbe   :  { %2700 = vrot.lane.b32.xlu0 %v2699_v9, %s3248_s9  ;;  %v2859_v9 = vpack.i.bf16 %v3666_v29, %v3658_v60 }
  0xc0   :  { %2695 = vrot.lane.b32.xlu1 %v2694_v10, %s3247_s6 }
  0xc2   :  { %2710 = vrot.lane.b32.xlu0 %v2654_v62, %s3249_s12  ;;  %v382_v62 = vld [vmem:[#allocation2 + $0x112] sm:$0xff] }
  0xc3   :  { %v2824_v0 = vpack.i.bf16 %v382_v62, %v381_v19  ;;  %v2854_v10 = vpack.i.bf16 %v430_v7, %v382_v62 }
  0xc4   :  { %2705 = vrot.lane.b32.xlu1 %v2704_v12, %s3248_s9 }
  0xc6   :  { %2720 = vrot.lane.b32.xlu0 %v2664_v23, %s3250_s13  ;;  %v2839_v23 = vpack.i.bf16 %v365_v58, %v459_v53 }
  0xc8   :  { %2715 = vrot.lane.b32.xlu1 %v2714_v16, %s3249_s12 }
  0xca   :  { %2730 = vrot.lane.b32.xlu0 %v2729_v6, %s3250_s13  ;;  %v479_v6 = vld [vmem:[#allocation2 + $0x132] sm:$0xff] }
  0xcb   :  { %v2884_v22 = vpack.i.bf16 %v479_v6, %v430_v7 }
  0xcc   :  { %2725 = vrot.lane.b32.xlu1 %v2724_v17, %s3243_s0  ;;  %v2874_v17 = vpack.i.bf16 %v463_v14, %v414_v5 }
  0xce   :  { %2740 = vrot.lane.b32.xlu0 %v2739_v25, %s3244_s26 }
  0xd0   :  { %2735 = vrot.lane.b32.xlu1 %v2734_v30, %s3243_s0 }
  0xd2   :  { %2750 = vrot.lane.b32.xlu0 %v2749_v36, %s3245_s27 }
  0xd4   :  { %2745 = vrot.lane.b32.xlu1 %v2744_v37, %s3244_s26 }
  0xd6   :  { %2760 = vrot.lane.b32.xlu0 %v2759_v40, %s3246_s28 }
  0xd8   :  { %2755 = vrot.lane.b32.xlu1 %v2754_v33, %s3245_s27 }
  0xda   :  { %2770 = vrot.lane.b32.xlu0 %v2769_v27, %s3247_s6 }
  0xdc   :  { %2765 = vrot.lane.b32.xlu1 %v2764_v39, %s3246_s28 }
  0xde   :  { %2780 = vrot.lane.b32.xlu0 %v2779_v46, %s3248_s9 }
  0xe0   :  { %2775 = vrot.lane.b32.xlu1 %v2774_v48, %s3247_s6 }
  0xe2   :  { %2790 = vrot.lane.b32.xlu0 %v2734_v30, %s3249_s12 }
  0xe4   :  { %2785 = vrot.lane.b32.xlu1 %v2784_v50, %s3248_s9 }
  0xe6   :  { %2800 = vrot.lane.b32.xlu0 %v2744_v37, %s3250_s13 }
  0xe8   :  { %2795 = vrot.lane.b32.xlu1 %v2794_v55, %s3249_s12 }
  0xea   :  { %2810 = vrot.lane.b32.xlu0 %v2809_v56, %s3250_s13 }
  0xec   :  { %2805 = vrot.lane.b32.xlu1 %v2794_v55, %s3243_s0 }
  0xee   :  { %2820 = vrot.lane.b32.xlu0 %v2809_v56, %s3244_s26 }
  0xf0   :  { %2815 = vrot.lane.b32.xlu1 %v2814_v61, %s3243_s0 }
  0xf2   :  { %2830 = vrot.lane.b32.xlu0 %v2829_v63, %s3245_s27 }
  0xf4   :  { %2825 = vrot.lane.b32.xlu1 %v2824_v0, %s3244_s26 }
  0xf6   :  { %2840 = vrot.lane.b32.xlu0 %v2839_v23, %s3246_s28 }
  0xf8   :  { %2835 = vrot.lane.b32.xlu1 %v2834_v3, %s3245_s27  ;;  %s3254_s27 = smov 64  }
  0xfa   :  { %2850 = vrot.lane.b32.xlu0 %v2849_v47, %s3247_s6 }
  0xfc   :  { %2845 = vrot.lane.b32.xlu1 %v2844_v43, %s3246_s28  ;;  %v2571_v8 = vpop.permute.xlu0 %2570 }
  0xfd   :  { %v2573_v11 = vunpack.i.h.bf16 %v2571_v8  ;;  %v2572_v25 = vunpack.i.l.bf16 %v2571_v8 }
  0xfe   :  { %2860 = vrot.lane.b32.xlu0 %v2859_v9, %s3248_s9 }
  0xff   :  { %v993_v45 = vsel %vm22_vm1, %v3545_v20, %v2573_v11  ;;  %v992_v27 = vsel %vm22_vm1, %v335_v31, %v2572_v25 }
 0x100   :  { %2855 = vrot.lane.b32.xlu1 %v2854_v10, %s3247_s6  ;;  %v2581_v12 = vpop.permute.xlu0 %2580 }
 0x101   :  { %v2583_v37 = vunpack.i.h.bf16 %v2581_v12  ;;  %v2582_v40 = vunpack.i.l.bf16 %v2581_v12 }
 0x102   :  { %v2576_v51 = vpop.permute.xlu1 %2575  ;;  %2870 = vrot.lane.b32.xlu0 %v2814_v61, %s3249_s12 }
 0x103   :  { %v2578_v35 = vunpack.i.h.bf16 %v2576_v51  ;;  %v2577_v36 = vunpack.i.l.bf16 %v2576_v51  ;;  %v1008_v58 = vsel %vm74_vm0, %v992_v27, %v2582_v40  ;;  %v1009_v20 = vsel %vm74_vm0, %v993_v45, %v2583_v37 }
 0x104   :  { %2865 = vrot.lane.b32.xlu1 %v2864_v13, %s3248_s9  ;;  %v2591_v15 = vpop.permute.xlu0 %2590 }
 0x105   :  { %v2593_v39 = vunpack.i.h.bf16 %v2591_v15  ;;  %v2592_v44 = vunpack.i.l.bf16 %v2591_v15  ;;  %v995_v55 = vsel %vm22_vm1, %v3558_v32, %v2578_v35  ;;  %v994_v56 = vsel %vm22_vm1, %v3547_v21, %v2577_v36 }
 0x106   :  { %v2586_v16 = vpop.permute.xlu1 %2585  ;;  %2880 = vrot.lane.b32.xlu0 %v2824_v0, %s3250_s13 }
 0x107   :  { %v2588_v48 = vunpack.i.h.bf16 %v2586_v16  ;;  %v2587_v50 = vunpack.i.l.bf16 %v2586_v16  ;;  %v1025_v0 = vsel %vm1024_vm5, %v1008_v58, %v2592_v44  ;;  %v1026_v1 = vsel %vm1024_vm5, %v1009_v20, %v2593_v39 }
 0x108   :  { %2875 = vrot.lane.b32.xlu1 %v2874_v17, %s3249_s12  ;;  %v2601_v24 = vpop.permute.xlu0 %2600 }
 0x109   :  { %v2603_v53 = vunpack.i.h.bf16 %v2601_v24  ;;  %v2602_v54 = vunpack.i.l.bf16 %v2601_v24  ;;  %v1010_v5 = vsel %vm74_vm0, %v994_v56, %v2587_v50  ;;  %v1011_v21 = vsel %vm74_vm0, %v995_v55, %v2588_v48 }
 0x10a   :  { %v2596_v2 = vpop.permute.xlu1 %2595 }
 0x10b   :  { %v2598_v61 = vunpack.i.h.bf16 %v2596_v2  ;;  %v2597_v19 = vunpack.i.l.bf16 %v2596_v2  ;;  %v1042_v47 = vsel %vm1041_vm6, %v1025_v0, %v2602_v54  ;;  %v1043_v43 = vsel %vm1041_vm6, %v1026_v1, %v2603_v53 }
 0x10c   :  { %2885 = vrot.lane.b32.xlu1 %v2884_v22, %s3250_s13  ;;  %v2611_v30 = vpop.permute.xlu0 %2610 }
 0x10d   :  { %v2613_v62 = vunpack.i.h.bf16 %v2611_v30  ;;  %v2612_v63 = vunpack.i.l.bf16 %v2611_v30  ;;  %v1027_v12 = vsel %vm1024_vm5, %v1010_v5, %v2597_v19  ;;  %v1028_v51 = vsel %vm1024_vm5, %v1011_v21, %v2598_v61 }
 0x10e   :  { %v2606_v33 = vpop.permute.xlu1 %2605 }
 0x10f   :  { %v2608_v7 = vunpack.i.h.bf16 %v2606_v33  ;;  %v2607_v8 = vunpack.i.l.bf16 %v2606_v33  ;;  %v1059_v13 = vsel %vm1058_vm7, %v1042_v47, %v2612_v63  ;;  %v1060_v14 = vsel %vm1058_vm7, %v1043_v43, %v2613_v62 }
 0x110   :  { %v2621_v46 = vpop.permute.xlu0 %2620 }
 0x111   :  { %v2623_v23 = vunpack.i.h.bf16 %v2621_v46  ;;  %v2622_v3 = vunpack.i.l.bf16 %v2621_v46  ;;  %v1044_v30 = vsel %vm1041_vm6, %v1027_v12, %v2607_v8  ;;  %v1045_v31 = vsel %vm1041_vm6, %v1028_v51, %v2608_v7 }
 0x112   :  { %v2616_v59 = vpop.permute.xlu1 %2615 }
 0x113   :  { %v2618_v15 = vunpack.i.h.bf16 %v2616_v59  ;;  %v2617_v16 = vunpack.i.l.bf16 %v2616_v59  ;;  %v1076_v6 = vsel %vm1075_vm8, %v1059_v13, %v2622_v3  ;;  %v1077_v24 = vsel %vm1075_vm8, %v1060_v14, %v2623_v23 }
 0x114   :  { %v2631_v32 = vpop.permute.xlu0 %2630 }
 0x115   :  { %v2633_v10 = vunpack.i.h.bf16 %v2631_v32  ;;  %v2632_v57 = vunpack.i.l.bf16 %v2631_v32  ;;  %v1061_v39 = vsel %vm1058_vm7, %v1044_v30, %v2617_v16  ;;  %v1062_v44 = vsel %vm1058_vm7, %v1045_v31, %v2618_v15 }
 0x116   :  { %v2626_v9 = vpop.permute.xlu1 %2625 }
 0x117   :  { %v2628_v2 = vunpack.i.h.bf16 %v2626_v9  ;;  %v2627_v22 = vunpack.i.l.bf16 %v2626_v9  ;;  %v1093_v36 = vsel %vm1092_vm9, %v1076_v6, %v2632_v57  ;;  %v1094_v37 = vsel %vm1092_vm9, %v1077_v24, %v2633_v10 }
 0x118   :  { %v2641_v17 = vpop.permute.xlu0 %2640 }
 0x119   :  { %v2643_v11 = vunpack.i.h.bf16 %v2641_v17  ;;  %v2642_v25 = vunpack.i.l.bf16 %v2641_v17  ;;  %v1078_v50 = vsel %vm1075_vm8, %v1061_v39, %v2627_v22  ;;  %v1079_v53 = vsel %vm1075_vm8, %v1062_v44, %v2628_v2 }
 0x11a   :  { %v2636_v35 = vpop.permute.xlu1 %2635 }
 0x11b   :  { %v2638_v40 = vunpack.i.h.bf16 %v2636_v35  ;;  %v2637_v33 = vunpack.i.l.bf16 %v2636_v35  ;;  %v1110_v45 = vsel %vm1109_vm10, %v1093_v36, %v2642_v25  ;;  %v1111_v27 = vsel %vm1109_vm10, %v1094_v37, %v2643_v11 }
 0x11c   :  { %v2651_v46 = vpop.permute.xlu0 %2650  ;;  %v1126_v48 = vpack.c.bf16 %v1111_v27, %v1110_v45 }
 0x11d   :  { %v2653_v54 = vunpack.i.h.bf16 %v2651_v46  ;;  %v2652_v55 = vunpack.i.l.bf16 %v2651_v46  ;;  %v1095_v56 = vsel %vm1092_vm9, %v1078_v50, %v2637_v33  ;;  %v1096_v58 = vsel %vm1092_vm9, %v1079_v53, %v2638_v40 }
 0x11e   :  { %v2646_v20 = vpop.permute.xlu1 %2645  ;;  %2469 = vmatprep.mubr.msk.bf16.mxu0 %vm1161_vm11, %v1126_v48 }
 0x11f   :  { %v1113_v59 = vsel %vm1109_vm10, %v1096_v58, %v2653_v54  ;;  %v1112_v61 = vsel %vm1109_vm10, %v1095_v56, %v2652_v55  ;;  %v2648_v32 = vunpack.i.h.bf16 %v2646_v20  ;;  %v2647_v5 = vunpack.i.l.bf16 %v2646_v20 }
 0x120   :  { %v2661_v19 = vpop.permute.xlu0 %2660  ;;  %v1127_v62 = vpack.c.bf16 %v1113_v59, %v1112_v61 }
 0x121   :  { %v2663_v7 = vunpack.i.h.bf16 %v2661_v19  ;;  %v2662_v8 = vunpack.i.l.bf16 %v2661_v19  ;;  %v997_v10 = vsel %vm22_vm1, %v3585_v52, %v2648_v32  ;;  %v996_v57 = vsel %vm22_vm1, %v3560_v34, %v2647_v5 }
 0x122   :  { %v2656_v63 = vpop.permute.xlu1 %2655  ;;  %2470 = vmatmul.mubr.msk.bf16.vlgmr.msra.gmra.mrb[0].mxu0 %vm1161_vm11, %v1127_v62 }
 0x123   :  { %v2658_v47 = vunpack.i.h.bf16 %v2656_v63  ;;  %v2657_v43 = vunpack.i.l.bf16 %v2656_v63  ;;  %v1013_v2 = vsel %vm74_vm0, %v997_v10, %v2663_v7  ;;  %v1012_v52 = vsel %vm74_vm0, %v996_v57, %v2662_v8 }
 0x124   :  { %v2671_v0 = vpop.permute.xlu0 %2670 }
 0x125   :  { %v2673_v12 = vunpack.i.h.bf16 %v2671_v0  ;;  %v2672_v51 = vunpack.i.l.bf16 %v2671_v0  ;;  %v999_v6 = vsel %vm22_vm1, %v3607_v4, %v2658_v47  ;;  %v998_v24 = vsel %vm22_vm1, %v3599_v18, %v2657_v43 }
 0x126   :  { %v2666_v1 = vpop.permute.xlu1 %2665 }
 0x127   :  { %v2668_v14 = vunpack.i.h.bf16 %v2666_v1  ;;  %v2667_v15 = vunpack.i.l.bf16 %v2666_v1  ;;  %v1029_v31 = vsel %vm1024_vm5, %v1012_v52, %v2672_v51  ;;  %v1030_v35 = vsel %vm1024_vm5, %v1013_v2, %v2673_v12 }
 0x128   :  { %v2681_v23 = vpop.permute.xlu0 %2680 }
 0x129   :  { %v2683_v16 = vunpack.i.h.bf16 %v2681_v23  ;;  %v2682_v17 = vunpack.i.l.bf16 %v2681_v23  ;;  %v1014_v4 = vsel %vm74_vm0, %v998_v24, %v2667_v15  ;;  %v1015_v18 = vsel %vm74_vm0, %v999_v6, %v2668_v14 }
 0x12a   :  { %v2676_v3 = vpop.permute.xlu1 %2675 }
 0x12b   :  { %v2678_v11 = vunpack.i.h.bf16 %v2676_v3  ;;  %v2677_v34 = vunpack.i.l.bf16 %v2676_v3  ;;  %v1046_v33 = vsel %vm1041_vm6, %v1029_v31, %v2682_v17  ;;  %v1047_v45 = vsel %vm1041_vm6, %v1030_v35, %v2683_v16 }
 0x12c   :  { %v2691_v21 = vpop.permute.xlu0 %2690 }
 0x12d   :  { %v2693_v25 = vunpack.i.h.bf16 %v2691_v21  ;;  %v2692_v30 = vunpack.i.l.bf16 %v2691_v21  ;;  %v1031_v50 = vsel %vm1024_vm5, %v1014_v4, %v2677_v34  ;;  %v1032_v53 = vsel %vm1024_vm5, %v1015_v18, %v2678_v11 }
 0x12e   :  { %v2686_v9 = vpop.permute.xlu1 %2685 }
 0x12f   :  { %v2688_v27 = vunpack.i.h.bf16 %v2686_v9  ;;  %v2687_v39 = vunpack.i.l.bf16 %v2686_v9  ;;  %v1063_v54 = vsel %vm1058_vm7, %v1046_v33, %v2692_v30  ;;  %v1064_v55 = vsel %vm1058_vm7, %v1047_v45, %v2693_v25 }
 0x130   :  { %v2701_v13 = vpop.permute.xlu0 %2700 }
 0x131   :  { %v2703_v36 = vunpack.i.h.bf16 %v2701_v13  ;;  %v2702_v37 = vunpack.i.l.bf16 %v2701_v13  ;;  %v1048_v1 = vsel %vm1041_vm6, %v1031_v50, %v2687_v39  ;;  %v1049_v23 = vsel %vm1041_vm6, %v1032_v53, %v2688_v27 }
 0x132   :  { %v2696_v22 = vpop.permute.xlu1 %2695 }
 0x133   :  { %v2698_v56 = vunpack.i.h.bf16 %v2696_v22  ;;  %v2697_v58 = vunpack.i.l.bf16 %v2696_v22  ;;  %v1080_v20 = vsel %vm1075_vm8, %v1063_v54, %v2702_v37  ;;  %v1081_v59 = vsel %vm1075_vm8, %v1064_v55, %v2703_v36  ;;  %v343_v37 = vld [vmem:[#allocation2 + $0xa0] sm:$0xff] }
 0x134   :  { %v2711_v40 = vpop.permute.xlu0 %2710 }
 0x135   :  { %v2713_v46 = vunpack.i.h.bf16 %v2711_v40  ;;  %v2712_v48 = vunpack.i.l.bf16 %v2711_v40  ;;  %v1065_v8 = vsel %vm1058_vm7, %v1048_v1, %v2697_v58  ;;  %v1066_v9 = vsel %vm1058_vm7, %v1049_v23, %v2698_v56 }
 0x136   :  { %v2706_v44 = vpop.permute.xlu1 %2705 }
 0x137   :  { %v2708_v19 = vunpack.i.h.bf16 %v2706_v44  ;;  %v2707_v62 = vunpack.i.l.bf16 %v2706_v44  ;;  %v1097_v3 = vsel %vm1092_vm9, %v1080_v20, %v2712_v48  ;;  %v1098_v32 = vsel %vm1092_vm9, %v1081_v59, %v2713_v46 }
 0x138   :  { %v2721_v61 = vpop.permute.xlu0 %2720 }
 0x139   :  { %v2723_v63 = vunpack.i.h.bf16 %v2721_v61  ;;  %v2722_v0 = vunpack.i.l.bf16 %v2721_v61  ;;  %v1083_v12 = vsel %vm1075_vm8, %v1066_v9, %v2708_v19  ;;  %v1082_v51 = vsel %vm1075_vm8, %v1065_v8, %v2707_v62 }
 0x13a   :  { %v2716_v5 = vpop.permute.xlu1 %2715 }
 0x13b   :  { %v2718_v21 = vunpack.i.h.bf16 %v2716_v5  ;;  %v2717_v47 = vunpack.i.l.bf16 %v2716_v5  ;;  %v1114_v43 = vsel %vm1109_vm10, %v1097_v3, %v2722_v0  ;;  %v1115_v7 = vsel %vm1109_vm10, %v1098_v32, %v2723_v63 }
 0x13c   :  { %v1128_v10 = vpack.c.bf16 %v1115_v7, %v1114_v43  ;;  %v2731_v57 = vpop.permute.xlu0 %2730 }
 0x13d   :  { %v2733_v13 = vunpack.i.h.bf16 %v2731_v57  ;;  %v2732_v14 = vunpack.i.l.bf16 %v2731_v57  ;;  %v1099_v15 = vsel %vm1092_vm9, %v1082_v51, %v2717_v47  ;;  %v1100_v16 = vsel %vm1092_vm9, %v1083_v12, %v2718_v21 }
 0x13e   :  { %v2726_v17 = vpop.permute.xlu1 %2725  ;;  %2473 = vmatprep.mubr.msk.bf16.mxu0 %vm1161_vm11, %v1128_v10 }
 0x13f   :  { %v1117_v6 = vsel %vm1109_vm10, %v1100_v16, %v2733_v13  ;;  %v1116_v24 = vsel %vm1109_vm10, %v1099_v15, %v2732_v14  ;;  %v2728_v31 = vunpack.i.h.bf16 %v2726_v17  ;;  %v2727_v35 = vunpack.i.l.bf16 %v2726_v17 }
 0x140   :  { %v1129_v2 = vpack.c.bf16 %v1117_v6, %v1116_v24  ;;  %v2741_v52 = vpop.permute.xlu0 %2740 }
 0x141   :  { %v2743_v18 = vunpack.i.h.bf16 %v2741_v52  ;;  %v2742_v33 = vunpack.i.l.bf16 %v2741_v52  ;;  %v1001_v27 = vsel %vm22_vm1, %v3624_v26, %v2728_v31  ;;  %v1000_v39 = vsel %vm22_vm1, %v343_v37, %v2727_v35 }
 0x142   :  { %v2736_v22 = vpop.permute.xlu1 %2735  ;;  %2474 = vmatmul.mubr.msk.bf16.gmra.mrb[4].mxu0 %vm1161_vm11, %v1129_v2 }
 0x143   :  { %v2738_v40 = vunpack.i.h.bf16 %v2736_v22  ;;  %v2737_v4 = vunpack.i.l.bf16 %v2736_v22  ;;  %v1017_v20 = vsel %vm74_vm0, %v1001_v27, %v2743_v18  ;;  %v1016_v59 = vsel %vm74_vm0, %v1000_v39, %v2742_v33 }
 0x144   :  { %v2751_v11 = vpop.permute.xlu0 %2750 }
 0x145   :  { %v2753_v44 = vunpack.i.h.bf16 %v2751_v11  ;;  %v2752_v46 = vunpack.i.l.bf16 %v2751_v11  ;;  %v1003_v56 = vsel %vm22_vm1, %v3636_v41, %v2738_v40  ;;  %v1002_v58 = vsel %vm22_vm1, %v3626_v28, %v2737_v4 }
 0x146   :  { %v2746_v34 = vpop.permute.xlu1 %2745 }
 0x147   :  { %v2748_v50 = vunpack.i.h.bf16 %v2746_v34  ;;  %v2747_v53 = vunpack.i.l.bf16 %v2746_v34  ;;  %v1033_v0 = vsel %vm1024_vm5, %v1016_v59, %v2752_v46  ;;  %v1034_v1 = vsel %vm1024_vm5, %v1017_v20, %v2753_v44 }
 0x148   :  { %v2761_v25 = vpop.permute.xlu0 %2760 }
 0x149   :  { %v2763_v54 = vunpack.i.h.bf16 %v2761_v25  ;;  %v2762_v55 = vunpack.i.l.bf16 %v2761_v25  ;;  %v1018_v41 = vsel %vm74_vm0, %v1002_v58, %v2747_v53  ;;  %v1019_v28 = vsel %vm74_vm0, %v1003_v56, %v2748_v50 }
 0x14a   :  { %v2756_v30 = vpop.permute.xlu1 %2755 }
 0x14b   :  { %v2758_v61 = vunpack.i.h.bf16 %v2756_v30  ;;  %v2757_v19 = vunpack.i.l.bf16 %v2756_v30  ;;  %v1050_v5 = vsel %vm1041_vm6, %v1033_v0, %v2762_v55  ;;  %v1051_v21 = vsel %vm1041_vm6, %v1034_v1, %v2763_v54 }
 0x14c   :  { %v2771_v36 = vpop.permute.xlu0 %2770 }
 0x14d   :  { %v2773_v62 = vunpack.i.h.bf16 %v2771_v36  ;;  %v2772_v63 = vunpack.i.l.bf16 %v2771_v36  ;;  %v1035_v10 = vsel %vm1024_vm5, %v1018_v41, %v2757_v19  ;;  %v1036_v57 = vsel %vm1024_vm5, %v1019_v28, %v2758_v61 }
 0x14e   :  { %v2766_v45 = vpop.permute.xlu1 %2765 }
 0x14f   :  { %v2768_v47 = vunpack.i.h.bf16 %v2766_v45  ;;  %v2767_v43 = vunpack.i.l.bf16 %v2766_v45  ;;  %v1067_v12 = vsel %vm1058_vm7, %v1050_v5, %v2772_v63  ;;  %v1068_v51 = vsel %vm1058_vm7, %v1051_v21, %v2773_v62 }
 0x150   :  { %v2781_v48 = vpop.permute.xlu0 %2780 }
 0x151   :  { %v2783_v23 = vunpack.i.h.bf16 %v2781_v48  ;;  %v2782_v3 = vunpack.i.l.bf16 %v2781_v48  ;;  %v1052_v22 = vsel %vm1041_vm6, %v1035_v10, %v2767_v43  ;;  %v1053_v11 = vsel %vm1041_vm6, %v1036_v57, %v2768_v47 }
 0x152   :  { %v2776_v26 = vpop.permute.xlu1 %2775 }
 0x153   :  { %v2778_v13 = vunpack.i.h.bf16 %v2776_v26  ;;  %v2777_v14 = vunpack.i.l.bf16 %v2776_v26  ;;  %v1084_v15 = vsel %vm1075_vm8, %v1067_v12, %v2782_v3  ;;  %v1085_v16 = vsel %vm1075_vm8, %v1068_v51, %v2783_v23 }
 0x154   :  { %v2791_v32 = vpop.permute.xlu0 %2790 }
 0x155   :  { %v2793_v8 = vunpack.i.h.bf16 %v2791_v32  ;;  %v2792_v9 = vunpack.i.l.bf16 %v2791_v32  ;;  %v1069_v40 = vsel %vm1058_vm7, %v1052_v22, %v2777_v14  ;;  %v1070_v4 = vsel %vm1058_vm7, %v1053_v11, %v2778_v13 }
 0x156   :  { %v2786_v7 = vpop.permute.xlu1 %2785 }
 0x157   :  { %v2788_v6 = vunpack.i.h.bf16 %v2786_v7  ;;  %v2787_v24 = vunpack.i.l.bf16 %v2786_v7  ;;  %v1101_v34 = vsel %vm1092_vm9, %v1084_v15, %v2792_v9  ;;  %v1102_v25 = vsel %vm1092_vm9, %v1085_v16, %v2793_v8 }
 0x158   :  { %v2801_v17 = vpop.permute.xlu0 %2800 }
 0x159   :  { %v2803_v2 = vunpack.i.h.bf16 %v2801_v17  ;;  %v2802_v52 = vunpack.i.l.bf16 %v2801_v17  ;;  %v1086_v45 = vsel %vm1075_vm8, %v1069_v40, %v2787_v24  ;;  %v1087_v27 = vsel %vm1075_vm8, %v1070_v4, %v2788_v6 }
 0x15a   :  { %v2796_v30 = vpop.permute.xlu1 %2795 }
 0x15b   :  { %v2798_v31 = vunpack.i.h.bf16 %v2796_v30  ;;  %v2797_v35 = vunpack.i.l.bf16 %v2796_v30  ;;  %v1118_v36 = vsel %vm1109_vm10, %v1101_v34, %v2802_v52  ;;  %v1119_v37 = vsel %vm1109_vm10, %v1102_v25, %v2803_v2 }
 0x15c   :  { %v1130_v18 = vpack.c.bf16 %v1119_v37, %v1118_v36  ;;  %v2811_v33 = vpop.permute.xlu0 %2810 }
 0x15d   :  { %v2813_v39 = vunpack.i.h.bf16 %v2811_v33  ;;  %v2812_v44 = vunpack.i.l.bf16 %v2811_v33  ;;  %v1103_v46 = vsel %vm1092_vm9, %v1086_v45, %v2797_v35  ;;  %v1104_v48 = vsel %vm1092_vm9, %v1087_v27, %v2798_v31 }
 0x15e   :  { %v2806_v50 = vpop.permute.xlu1 %2805  ;;  %2477 = vmatprep.mubr.msk.bf16.mxu0 %vm1161_vm11, %v1130_v18 }
 0x15f   :  { %v1121_v53 = vsel %vm1109_vm10, %v1104_v48, %v2813_v39  ;;  %v1120_v54 = vsel %vm1109_vm10, %v1103_v46, %v2812_v44  ;;  %v2808_v62 = vunpack.i.h.bf16 %v2806_v50  ;;  %v2807_v63 = vunpack.i.l.bf16 %v2806_v50 }
 0x160   :  { %v1131_v55 = vpack.c.bf16 %v1121_v53, %v1120_v54  ;;  %v2821_v56 = vpop.permute.xlu0 %2820 }
 0x161   :  { %v2823_v0 = vunpack.i.h.bf16 %v2821_v56  ;;  %v2822_v23 = vunpack.i.l.bf16 %v2821_v56  ;;  %v1005_v28 = vsel %vm22_vm1, %v3647_v49, %v2808_v62  ;;  %v1004_v47 = vsel %vm22_vm1, %v3633_v38, %v2807_v63 }
 0x162   :  { %v2816_v58 = vpop.permute.xlu1 %2815  ;;  %2478 = vmatmul.mubr.msk.bf16.gmra.mrb[8].mxu0 %vm1161_vm11, %v1131_v55 }
 0x163   :  { %v2818_v3 = vunpack.i.h.bf16 %v2816_v58  ;;  %v2817_v32 = vunpack.i.l.bf16 %v2816_v58  ;;  %v1021_v43 = vsel %vm74_vm0, %v1005_v28, %v2823_v0  ;;  %v1020_v10 = vsel %vm74_vm0, %v1004_v47, %v2822_v23  ;;  %v3927_v47 = vld [vmem:[%s4322_s2] ss:$0 sm:$0xff]  ;;  %s3251_s2 = smov 40  }
 0x164   :  { %v2831_v20 = vpop.permute.xlu0 %2830 }
 0x165   :  { %v2833_v5 = vunpack.i.h.bf16 %v2831_v20  ;;  %v2832_v21 = vunpack.i.l.bf16 %v2831_v20  ;;  %v1007_v13 = vsel %vm22_vm1, %v3666_v29, %v2818_v3  ;;  %v1006_v49 = vsel %vm22_vm1, %v3658_v60, %v2817_v32 }
 0x166   :  { %v2826_v59 = vpop.permute.xlu1 %2825  ;;  %vm2058_vm1 = vcmask 392192  }
 0x167   :  { %v2828_v7 = vunpack.i.h.bf16 %v2826_v59  ;;  %v2827_v8 = vunpack.i.l.bf16 %v2826_v59  ;;  %v1037_v38 = vsel %vm1024_vm5, %v1020_v10, %v2832_v21  ;;  %v1038_v17 = vsel %vm1024_vm5, %v1021_v43, %v2833_v5 }
 0x168   :  { %v2841_v26 = vpop.permute.xlu0 %2840 }
 0x169   :  { %v2843_v12 = vunpack.i.h.bf16 %v2841_v26  ;;  %v2842_v51 = vunpack.i.l.bf16 %v2841_v26  ;;  %v1022_v2 = vsel %vm74_vm0, %v1006_v49, %v2827_v8  ;;  %v1023_v52 = vsel %vm74_vm0, %v1007_v13, %v2828_v7 }
 0x16a   :  { %v2836_v61 = vpop.permute.xlu1 %2835 }
 0x16b   :  { %v2837_v57 = vunpack.i.l.bf16 %v2836_v61  ;;  %v2838_v34 = vunpack.i.h.bf16 %v2836_v61  ;;  %v1054_v25 = vsel %vm1041_vm6, %v1037_v38, %v2842_v51  ;;  %v1055_v30 = vsel %vm1041_vm6, %v1038_v17, %v2843_v12 }
 0x16c   :  { %v2851_v19 = vpop.permute.xlu0 %2850 }
 0x16d   :  { %v2853_v14 = vunpack.i.h.bf16 %v2851_v19  ;;  %v2852_v15 = vunpack.i.l.bf16 %v2851_v19  ;;  %v1039_v60 = vsel %vm1024_vm5, %v1022_v2, %v2837_v57  ;;  %v1040_v56 = vsel %vm1024_vm5, %v1023_v52, %v2838_v34  ;;  %v1352_v2 = vld [vmem:[#allocation3 + $0x2] sm:$0xff] }
 0x16e   :  { %v2846_v1 = vpop.permute.xlu1 %2845 }
 0x16f   :  { %v2848_v31 = vunpack.i.h.bf16 %v2846_v1  ;;  %v2847_v35 = vunpack.i.l.bf16 %v2846_v1  ;;  %v1071_v36 = vsel %vm1058_vm7, %v1054_v25, %v2852_v15  ;;  %v1072_v37 = vsel %vm1058_vm7, %v1055_v30, %v2853_v14  ;;  %v1336_v15 = vld [vmem:[#allocation3 + $0x1] sm:$0xff] }
 0x170   :  { %v2861_v41 = vpop.permute.xlu0 %2860 }
 0x171   :  { %v2863_v6 = vunpack.i.h.bf16 %v2861_v41  ;;  %v2862_v24 = vunpack.i.l.bf16 %v2861_v41  ;;  %v1056_v26 = vsel %vm1041_vm6, %v1039_v60, %v2847_v35  ;;  %v1057_v61 = vsel %vm1041_vm6, %v1040_v56, %v2848_v31 }
 0x172   :  { %v2856_v9 = vpop.permute.xlu1 %2855 }
 0x173   :  { %v1088_v4 = vsel %vm1075_vm8, %v1071_v36, %v2862_v24  ;;  %v1089_v18 = vsel %vm1075_vm8, %v1072_v37, %v2863_v6  ;;  %v2858_v27 = vunpack.i.h.bf16 %v2856_v9  ;;  %v2857_v39 = vunpack.i.l.bf16 %v2856_v9 }
 0x174   :  { %v2871_v16 = vpop.permute.xlu0 %2870 }
 0x175   :  { %v2873_v11 = vunpack.i.h.bf16 %v2871_v16  ;;  %v2872_v29 = vunpack.i.l.bf16 %v2871_v16  ;;  %v1073_v19 = vsel %vm1058_vm7, %v1056_v26, %v2857_v39  ;;  %v1074_v62 = vsel %vm1058_vm7, %v1057_v61, %v2858_v27 }
 0x176   :  { %v3808_v22 = vpop.permute.xlu1 %2865 }
 0x177   :  { %v1105_v44 = vsel %vm1092_vm9, %v1088_v4, %v2872_v29  ;;  %v1106_v46 = vsel %vm1092_vm9, %v1089_v18, %v2873_v11  ;;  %v2868_v50 = vunpack.i.h.bf16 %v3808_v22  ;;  %v2867_v53 = vunpack.i.l.bf16 %v3808_v22  ;;  %v3212_v4 = vld [vmem:[%s4323_s3] sm:$0xff]  }
 0x178   :  { %v2881_v40 = vpop.permute.xlu0 %2880  ;;  %2485 = vmatprep.subr.bf16.mxu1 %v3212_v4 }
 0x179   :  { %v2883_v33 = vunpack.i.h.bf16 %v2881_v40  ;;  %v2882_v45 = vunpack.i.l.bf16 %v2881_v40  ;;  %v1090_v0 = vsel %vm1075_vm8, %v1073_v19, %v2867_v53  ;;  %v1091_v1 = vsel %vm1075_vm8, %v1074_v62, %v2868_v50  ;;  %2486 = vmatpush3.bf16.msra.mxu1 %v3212_v4  ;;  %v3215_v19 = vld [vmem:[%s4323_s3 + $0x18] sm:$0xff]  }
 0x17a   :  { %v3819_v48 = vpop.permute.xlu1 %2875 }
 0x17b   :  { %v1122_v54 = vsel %vm1109_vm10, %v1105_v44, %v2882_v45  ;;  %v1123_v55 = vsel %vm1109_vm10, %v1106_v46, %v2883_v33  ;;  %v2878_v58 = vunpack.i.h.bf16 %v3819_v48  ;;  %v2877_v20 = vunpack.i.l.bf16 %v3819_v48  ;;  %v3213_v45 = vld [vmem:[%s4323_s3 + $0x8] sm:$0xff]   ;;  %v3214_v44 = vld [vmem:[%s4323_s3 + $0x10] sm:$0xff]  }
 0x17c   :  { %v1132_v59 = vpack.c.bf16 %v1123_v55, %v1122_v54  ;;  %2487 = vmatprep.subr.bf16.mxu1 %v3213_v45 }
 0x17d   :  { %v1107_v32 = vsel %vm1092_vm9, %v1090_v0, %v2877_v20  ;;  %v1108_v41 = vsel %vm1092_vm9, %v1091_v1, %v2878_v58  ;;  %2488 = vmatpush3.bf16.msra.mxu1 %v3213_v45 }
 0x17e   :  { %v2886_v63 = vpop.permute.xlu1 %2885  ;;  %2481 = vmatprep.mubr.msk.bf16.mxu0 %vm1161_vm11, %v1132_v59  ;;  %2489 = vmatprep.subr.bf16.mxu1 %v3214_v44 }
 0x17f   :  { %v2888_v23 = vunpack.i.h.bf16 %v2886_v63  ;;  %v2887_v3 = vunpack.i.l.bf16 %v2886_v63  ;;  %v3216_v63 = vld [vmem:[%s4323_s3 + $0x20] ss:$0 sps:$4 sm:$0xff]  }
 0x180   :  { %v2187_v0 = vsel %vm2185_vm14, %v3216_v63, 0 }
 0x181   :  { %v1124_v28 = vsel %vm1109_vm10, %v1107_v32, %v2887_v3  ;;  %v1125_v5 = vsel %vm1109_vm10, %v1108_v41, %v2888_v23  ;;  %2490 = vmatpush3.bf16.msra.mxu1 %v3214_v44  ;;  %v1360_v44 = vld [vmem:[#allocation3 + $0xa2] sm:$0xff] }
 0x182   :  { %v1133_v21 = vpack.c.bf16 %v1125_v5, %v1124_v28  ;;  %2491 = vmatprep.subr.bf16.mxu1 %v3215_v19 }
 0x184   :  { %2482 = vmatmul.mubr.msk.bf16.gmra.mrb[12].mxu0 %vm1161_vm11, %v1133_v21  ;;  %v1456_v21 = vld [vmem:[#allocation3 + $0x92] sm:$0xff] }
 0x185   :  { %2492 = vmatpush3.bf16.msra.mxu1 %v3215_v19 }
 0x186   :  { %2512 = vmatprep.subr.msk.bf16.mxu1 %vm2185_vm14, %v3216_v63 }
 0x189   :  { %2494 = vmatpush3.bf16.msra.mxu1 %v2187_v0 }
 0x1f5   :  { %v2471_v43 = vpop.f32.mrb[0].mxu0 }
 0x1f6   :  { %v1233_v7 = vadd.f32 %v2471_v43, %v3927_v47  ;;  %v1224_v42 = vpop.f32.mrb[1].mxu0 }
 0x1f7   :  { %v1225_v8 = vadd.f32 %v3927_v47, %v1224_v42  ;;  %v2472_v9 = vpop.f32.mrb[2].mxu0 }
 0x1f8   :  { %v1289_v10 = vmax.f32 %v1233_v7, 0.0  ;;  %v1236_v57 = vadd.f32 %v2472_v9, %v3927_v47  ;;  %v1227_v12 = vpop.f32.mrb[3].mxu0 }
 0x1f9   :  { %v1287_v51 = vmax.f32 %v1225_v8, 0.0  ;;  %v1228_v13 = vadd.f32 %v3927_v47, %v1227_v12 }
 0x1fa   :  { %1306 = vst.msk [vmem:[#allocation3 + $0x31] sm:$0xff] %vm74_vm0, %v1289_v10  ;;  %v1290_v49 = vmax.f32 %v1236_v57, 0.0 }
 0x1fb   :  { %1304 = vst.msk [vmem:[#allocation3 + $0x11] sm:$0xff] %vm74_vm0, %v1287_v51  ;;  %v1288_v14 = vmax.f32 %v1228_v13, 0.0 }
 0x1fc   :  { %1307 = vst.msk [vmem:[#allocation3 + $0x41] sm:$0xff] %vm74_vm0, %v1290_v49 }
 0x1fd   :  { %1305 = vst.msk [vmem:[#allocation3 + $0x21] sm:$0xff] %vm74_vm0, %v1288_v14 }
 0x201   :  { %v3937_v17 = vld [vmem:[#allocation3 + $0x30] sm:$0xff] }
 0x202   :  { %v1337_v16 = vld [vmem:[#allocation3 + $0x11] sm:$0xff] }
 0x203   :  { %v2889_v38 = vpack.i.bf16 %v1337_v16, %v1336_v15  ;;  %v3939_v6 = vld [vmem:[#allocation3 + $0x40] sm:$0xff]  ;;  %v1353_v52 = vld [vmem:[#allocation3 + $0x12] sm:$0xff] }
 0x204   :  { %v2899_v24 = vpack.i.bf16 %v3939_v6, %v3937_v17  ;;  %v3944_v22 = vld [vmem:[#allocation3 + $0x41] sm:$0xff]  ;;  %v2894_v11 = vpack.i.bf16 %v1353_v52, %v1352_v2  ;;  %v1386_v29 = vld [vmem:[#allocation3 + $0x31] sm:$0xff] }
 0x205   :  { %2890 = vrot.lane.b32.xlu0 %v2889_v38, %s3244_s26  ;;  %v2904_v34 = vpack.i.bf16 %v3944_v22, %v1386_v29  ;;  %v3948_v60 = vld [vmem:[#allocation3 + $0x20] sm:$0xff]  ;;  %v3952_v30 = vld [vmem:[#allocation3 + $0x10] sm:$0xff] }
 0x206   :  { %2900 = vrot.lane.b32.xlu1 %v2899_v24, %s3248_s9  ;;  %v1403_v25 = vld [vmem:[#allocation3 + $0x42] sm:$0xff]  ;;  %v2924_v31 = vpack.i.bf16 %v3948_v60, %v3952_v30  ;;  %v1402_v35 = vld [vmem:[#allocation3 + $0x32] sm:$0xff]  ;;  %v2939_v55 = vpack.i.bf16 %v3937_v17, %v3948_v60 }
 0x207   :  { %v2909_v36 = vpack.i.bf16 %v1403_v25, %v1402_v35  ;;  %v1385_v37 = vld [vmem:[#allocation3 + $0x21] sm:$0xff] }
 0x208   :  { %v2929_v40 = vpack.i.bf16 %v1385_v37, %v1337_v16  ;;  %v2914_v18 = vpack.i.bf16 %v1386_v29, %v1385_v37  ;;  %v1401_v33 = vld [vmem:[#allocation3 + $0x22] sm:$0xff] }
 0x209   :  { %2895 = vrot.lane.b32.xlu0 %v2894_v11, %s3246_s28  ;;  %v2934_v27 = vpack.i.bf16 %v1401_v33, %v1353_v52  ;;  %v2919_v39 = vpack.i.bf16 %v1402_v35, %v1401_v33  ;;  %v1440_v33 = vld [vmem:[#allocation3 + $0x91] sm:$0xff] }
 0x20a   :  { %2905 = vrot.lane.b32.xlu1 %v2904_v34, %s3250_s13 }
 0x20d   :  { %2925 = vrot.lane.b32.xlu0 %v2924_v31, %s3248_s9  ;;  %v1424_v31 = vld [vmem:[#allocation3 + $0x90] sm:$0xff] }
 0x20e   :  { %2910 = vrot.lane.b32.xlu1 %v2909_v36, %s3251_s2 }
 0x211   :  { %2930 = vrot.lane.b32.xlu0 %v2929_v40, %s3250_s13 }
 0x212   :  { %2915 = vrot.lane.b32.xlu1 %v2914_v18, %s3244_s26 }
 0x215   :  { %v2475_v46 = vpop.f32.mrb[4].mxu0  ;;  %2935 = vrot.lane.b32.xlu0 %v2934_v27, %s3251_s2 }
 0x216   :  { %v1249_v48 = vadd.f32 %v2475_v46, %v3927_v47  ;;  %v1240_v50 = vpop.f32.mrb[5].mxu0  ;;  %2920 = vrot.lane.b32.xlu1 %v2919_v39, %s3246_s28 }
 0x217   :  { %v1241_v53 = vadd.f32 %v3927_v47, %v1240_v50  ;;  %v2476_v54 = vpop.f32.mrb[6].mxu0  ;;  %v1344_v50 = vld [vmem:[#allocation3 + $0xa1] sm:$0xff] }
 0x218   :  { %v1293_v56 = vmax.f32 %v1249_v48, 0.0  ;;  %v1252_v58 = vadd.f32 %v2476_v54, %v3927_v47  ;;  %v1243_v20 = vpop.f32.mrb[7].mxu0 }
 0x219   :  { %v1291_v59 = vmax.f32 %v1241_v53, 0.0  ;;  %v1244_v26 = vadd.f32 %v3927_v47, %v1243_v20  ;;  %2940 = vrot.lane.b32.xlu0 %v2939_v55, %s3252_s21 }
 0x21a   :  { %1310 = vst.msk [vmem:[#allocation3 + $0x71] sm:$0xff] %vm74_vm0, %v1293_v56  ;;  %v1294_v61 = vmax.f32 %v1252_v58, 0.0 }
 0x21b   :  { %1308 = vst.msk [vmem:[#allocation3 + $0x51] sm:$0xff] %vm74_vm0, %v1291_v59  ;;  %v1292_v62 = vmax.f32 %v1244_v26, 0.0 }
 0x21c   :  { %1311 = vst.msk [vmem:[#allocation3 + $0x81] sm:$0xff] %vm74_vm0, %v1294_v61 }
 0x21d   :  { %1309 = vst.msk [vmem:[#allocation3 + $0x61] sm:$0xff] %vm74_vm0, %v1292_v62  ;;  %2945 = vrot.lane.b32.xlu0 %v2914_v18, %s3253_s24 }
 0x221   :  { %2950 = vrot.lane.b32.xlu0 %v2919_v39, %s3254_s27  ;;  %v4003_v8 = vld [vmem:[#allocation3 + $0x70] sm:$0xff] }
 0x222   :  { %v3990_v1 = vld [vmem:[#allocation3 + $0x50] sm:$0xff] }
 0x223   :  { %v1452_v23 = vld [vmem:[#allocation3 + $0x52] sm:$0xff]  ;;  %v2954_v3 = vpack.i.bf16 %v3990_v1, %v3939_v6  ;;  %v1455_v5 = vld [vmem:[#allocation3 + $0x82] sm:$0xff] }
 0x224   :  { %v2969_v32 = vpack.i.bf16 %v1452_v23, %v1403_v25  ;;  %v1436_v41 = vld [vmem:[#allocation3 + $0x51] sm:$0xff]  ;;  %v3004_v43 = vpack.i.bf16 %v1456_v21, %v1455_v5  ;;  %v1375_v7 = vld [vmem:[#allocation3 + $0x80] sm:$0xff] }
 0x225   :  { %2955 = vrot.lane.b32.xlu1 %v2954_v3, %s3252_s21  ;;  %v2959_v28 = vpack.i.bf16 %v1436_v41, %v3944_v22  ;;  %v3999_v42 = vld [vmem:[#allocation3 + $0x60] sm:$0xff]  ;;  %v2979_v9 = vpack.i.bf16 %v1375_v7, %v4003_v8  ;;  %v1390_v51 = vld [vmem:[#allocation3 + $0x71] sm:$0xff]  ;;  %v2994_v4 = vpack.i.bf16 %v1424_v31, %v1375_v7 }
 0x226   :  { %2970 = vrot.lane.b32.xlu0 %v2969_v32, %s3254_s27  ;;  %v3019_v10 = vpack.i.bf16 %v3999_v42, %v3990_v1  ;;  %v1391_v57 = vld [vmem:[#allocation3 + $0x81] sm:$0xff]  ;;  %v1406_v24 = vld [vmem:[#allocation3 + $0x72] sm:$0xff]  ;;  %v3034_v18 = vpack.i.bf16 %v4003_v8, %v3999_v42 }
 0x227   :  { %v1389_v12 = vld [vmem:[#allocation3 + $0x61] sm:$0xff]  ;;  %v2984_v13 = vpack.i.bf16 %v1391_v57, %v1390_v51  ;;  %v2989_v22 = vpack.i.bf16 %v1455_v5, %v1406_v24  ;;  %v2999_v45 = vpack.i.bf16 %v1440_v33, %v1391_v57 }
 0x228   :  { %v3024_v49 = vpack.i.bf16 %v1389_v12, %v1436_v41  ;;  %v1405_v14 = vld [vmem:[#allocation3 + $0x62] sm:$0xff]  ;;  %v3039_v27 = vpack.i.bf16 %v1390_v51, %v1389_v12 }
 0x229   :  { %2960 = vrot.lane.b32.xlu1 %v2959_v28, %s3253_s24  ;;  %v3029_v11 = vpack.i.bf16 %v1405_v14, %v1452_v23  ;;  %v3044_v39 = vpack.i.bf16 %v1406_v24, %v1405_v14 }
 0x22a   :  { %2975 = vrot.lane.b32.xlu0 %v2969_v32, %s3246_s28 }
 0x22d   :  { %2965 = vrot.lane.b32.xlu1 %v2959_v28, %s3244_s26 }
 0x22e   :  { %3005 = vrot.lane.b32.xlu0 %v3004_v43, %s3254_s27 }
 0x231   :  { %2980 = vrot.lane.b32.xlu1 %v2979_v9, %s3248_s9 }
 0x232   :  { %3020 = vrot.lane.b32.xlu0 %v3019_v10, %s3248_s9 }
 0x235   :  { %v2479_v15 = vpop.f32.mrb[8].mxu0  ;;  %2985 = vrot.lane.b32.xlu1 %v2984_v13, %s3250_s13 }
 0x236   :  { %3025 = vrot.lane.b32.xlu0 %v3024_v49, %s3250_s13  ;;  %v1265_v16 = vadd.f32 %v2479_v15, %v3927_v47  ;;  %v1256_v38 = vpop.f32.mrb[9].mxu0 }
 0x237   :  { %v1257_v2 = vadd.f32 %v3927_v47, %v1256_v38  ;;  %v2480_v52 = vpop.f32.mrb[10].mxu0 }
 0x238   :  { %v1297_v29 = vmax.f32 %v1265_v16, 0.0  ;;  %v1268_v34 = vadd.f32 %v2480_v52, %v3927_v47  ;;  %v1259_v25 = vpop.f32.mrb[11].mxu0 }
 0x239   :  { %v1295_v35 = vmax.f32 %v1257_v2, 0.0  ;;  %v1260_v36 = vadd.f32 %v3927_v47, %v1259_v25  ;;  %2990 = vrot.lane.b32.xlu1 %v2989_v22, %s3251_s2 }
 0x23a   :  { %3030 = vrot.lane.b32.xlu0 %v3029_v11, %s3251_s2  ;;  %1314 = vst.msk [vmem:[#allocation3 + $0xd1] sm:$0xff] %vm74_vm0, %v1297_v29  ;;  %v1298_v37 = vmax.f32 %v1268_v34, 0.0 }
 0x23b   :  { %1312 = vst.msk [vmem:[#allocation3 + $0xb1] sm:$0xff] %vm74_vm0, %v1295_v35  ;;  %v1296_v40 = vmax.f32 %v1260_v36, 0.0 }
 0x23c   :  { %1315 = vst.msk [vmem:[#allocation3 + $0xe1] sm:$0xff] %vm74_vm0, %v1298_v37 }
 0x23d   :  { %1313 = vst.msk [vmem:[#allocation3 + $0xc1] sm:$0xff] %vm74_vm0, %v1296_v40  ;;  %2995 = vrot.lane.b32.xlu1 %v2994_v4, %s3252_s21 }
 0x23e   :  { %3035 = vrot.lane.b32.xlu0 %v3034_v18, %s3252_s21 }
 0x241   :  { %3000 = vrot.lane.b32.xlu1 %v2999_v45, %s3253_s24  ;;  %v4042_v26 = vld [vmem:[#allocation3 + $0xd0] sm:$0xff] }
 0x242   :  { %3040 = vrot.lane.b32.xlu0 %v3039_v27, %s3253_s24  ;;  %v1361_v46 = vld [vmem:[#allocation3 + $0xb2] sm:$0xff] }
 0x243   :  { %v3054_v48 = vpack.i.bf16 %v1361_v46, %v1360_v44  ;;  %v1345_v53 = vld [vmem:[#allocation3 + $0xb1] sm:$0xff]  ;;  %v4038_v20 = vld [vmem:[#allocation3 + $0xe0] sm:$0xff] }
 0x244   :  { %v4030_v54 = vld [vmem:[#allocation3 + $0xc0] sm:$0xff]  ;;  %v4034_v55 = vld [vmem:[#allocation3 + $0xb0] sm:$0xff]  ;;  %v3049_v56 = vpack.i.bf16 %v1345_v53, %v1344_v50  ;;  %v3059_v61 = vpack.i.bf16 %v4038_v20, %v4042_v26 }
 0x245   :  { %3010 = vrot.lane.b32.xlu1 %v3039_v27, %s3244_s26  ;;  %v3084_v58 = vpack.i.bf16 %v4030_v54, %v4034_v55  ;;  %v1393_v59 = vld [vmem:[#allocation3 + $0xc1] sm:$0xff]  ;;  %v1394_v0 = vld [vmem:[#allocation3 + $0xd1] sm:$0xff]  ;;  %v3099_v21 = vpack.i.bf16 %v4042_v26, %v4030_v54 }
 0x246   :  { %3045 = vrot.lane.b32.xlu0 %v3044_v39, %s3254_s27  ;;  %v3089_v19 = vpack.i.bf16 %v1393_v59, %v1345_v53  ;;  %v1395_v62 = vld [vmem:[#allocation3 + $0xe1] sm:$0xff]  ;;  %v1410_v41 = vld [vmem:[#allocation3 + $0xd2] sm:$0xff]  ;;  %v3074_v14 = vpack.i.bf16 %v1394_v0, %v1393_v59 }
 0x247   :  { %v1409_v63 = vld [vmem:[#allocation3 + $0xc2] sm:$0xff]  ;;  %v3064_v23 = vpack.i.bf16 %v1395_v62, %v1394_v0  ;;  %v1432_v53 = vld [vmem:[#allocation3 + $0x130] sm:$0xff] }
 0x248   :  { %v3094_v3 = vpack.i.bf16 %v1409_v63, %v1361_v46  ;;  %v1411_v32 = vld [vmem:[#allocation3 + $0xe2] sm:$0xff]  ;;  %v3079_v38 = vpack.i.bf16 %v1410_v41, %v1409_v63 }
 0x249   :  { %3015 = vrot.lane.b32.xlu1 %v3044_v39, %s3246_s28  ;;  %v3069_v5 = vpack.i.bf16 %v1411_v32, %v1410_v41  ;;  %v1464_v41 = vld [vmem:[#allocation3 + $0x132] sm:$0xff] }
 0x24a   :  { %3055 = vrot.lane.b32.xlu0 %v3054_v48, %s3246_s28 }
 0x24d   :  { %3050 = vrot.lane.b32.xlu1 %v3049_v56, %s3244_s26 }
 0x24e   :  { %3085 = vrot.lane.b32.xlu0 %v3084_v58, %s3248_s9 }
 0x251   :  { %3060 = vrot.lane.b32.xlu1 %v3059_v61, %s3248_s9 }
 0x252   :  { %3090 = vrot.lane.b32.xlu0 %v3089_v19, %s3250_s13 }
 0x255   :  { %3065 = vrot.lane.b32.xlu1 %v3064_v23, %s3250_s13 }
 0x256   :  { %3095 = vrot.lane.b32.xlu0 %v3094_v3, %s3251_s2  ;;  %v1448_v3 = vld [vmem:[#allocation3 + $0x131] sm:$0xff] }
 0x257   :  { %v2483_v28 = vpop.f32.mrb[12].mxu0 }
 0x258   :  { %v1281_v43 = vadd.f32 %v2483_v28, %v3927_v47  ;;  %v1272_v7 = vpop.f32.mrb[13].mxu0 }
 0x259   :  { %v1273_v9 = vadd.f32 %v3927_v47, %v1272_v7  ;;  %v2484_v10 = vpop.f32.mrb[14].mxu0  ;;  %3070 = vrot.lane.b32.xlu1 %v3069_v5, %s3251_s2 }
 0x25a   :  { %3100 = vrot.lane.b32.xlu0 %v3099_v21, %s3252_s21  ;;  %v1301_v57 = vmax.f32 %v1281_v43, 0.0  ;;  %v1284_v12 = vadd.f32 %v2484_v10, %v3927_v47  ;;  %v1275_v51 = vpop.f32.mrb[15].mxu0  ;;  %v1320_v43 = vld [vmem:[#allocation3] sm:$0xff] }
 0x25b   :  { %v1299_v13 = vmax.f32 %v1273_v9, 0.0  ;;  %v1276_v49 = vadd.f32 %v3927_v47, %v1275_v51 }
 0x25c   :  { %1318 = vst.msk [vmem:[#allocation3 + $0x111] sm:$0xff] %vm74_vm0, %v1301_v57  ;;  %v1302_v15 = vmax.f32 %v1284_v12, 0.0 }
 0x25d   :  { %1316 = vst.msk [vmem:[#allocation3 + $0xf1] sm:$0xff] %vm74_vm0, %v1299_v13  ;;  %v1300_v16 = vmax.f32 %v1276_v49, 0.0  ;;  %3075 = vrot.lane.b32.xlu1 %v3074_v14, %s3244_s26 }
 0x25e   :  { %3105 = vrot.lane.b32.xlu0 %v3074_v14, %s3253_s24  ;;  %1319 = vst.msk [vmem:[#allocation3 + $0x121] sm:$0xff] %vm74_vm0, %v1302_v15 }
 0x25f   :  { %1317 = vst.msk [vmem:[#allocation3 + $0x101] sm:$0xff] %vm74_vm0, %v1300_v16 }
 0x261   :  { %3080 = vrot.lane.b32.xlu1 %v3079_v38, %s3246_s28 }
 0x262   :  { %3110 = vrot.lane.b32.xlu0 %v3079_v38, %s3254_s27 }
 0x263   :  { %v4080_v35 = vld [vmem:[#allocation3 + $0x110] sm:$0xff] }
 0x264   :  { %v4066_v47 = vld [vmem:[#allocation3 + $0xf0] sm:$0xff] }
 0x265   :  { %v1460_v24 = vld [vmem:[#allocation3 + $0xf2] sm:$0xff]  ;;  %v3114_v2 = vpack.i.bf16 %v4066_v47, %v4038_v20  ;;  %v1383_v25 = vld [vmem:[#allocation3 + $0x120] sm:$0xff] }
 0x266   :  { %v3129_v52 = vpack.i.bf16 %v1460_v24, %v1411_v32  ;;  %v1444_v22 = vld [vmem:[#allocation3 + $0xf1] sm:$0xff]  ;;  %v4072_v29 = vld [vmem:[#allocation3 + $0x100] sm:$0xff]  ;;  %v3139_v36 = vpack.i.bf16 %v1383_v25, %v4080_v35  ;;  %v3154_v59 = vpack.i.bf16 %v1432_v53, %v1383_v25 }
 0x267   :  { %3115 = vrot.lane.b32.xlu1 %v3114_v2, %s3252_s21  ;;  %v3119_v11 = vpack.i.bf16 %v1444_v22, %v1395_v62  ;;  %v3174_v34 = vpack.i.bf16 %v4072_v29, %v4066_v47  ;;  %v1397_v31 = vld [vmem:[#allocation3 + $0x101] sm:$0xff]  ;;  %v1398_v18 = vld [vmem:[#allocation3 + $0x111] sm:$0xff]  ;;  %v3189_v50 = vpack.i.bf16 %v4080_v35, %v4072_v29 }
 0x268   :  { %3130 = vrot.lane.b32.xlu0 %v3129_v52, %s3254_s27  ;;  %v3179_v37 = vpack.i.bf16 %v1397_v31, %v1444_v22  ;;  %v1399_v40 = vld [vmem:[#allocation3 + $0x121] sm:$0xff]  ;;  %v1414_v46 = vld [vmem:[#allocation3 + $0x112] sm:$0xff]  ;;  %v3194_v61 = vpack.i.bf16 %v1398_v18, %v1397_v31 }
 0x269   :  { %v1413_v4 = vld [vmem:[#allocation3 + $0x102] sm:$0xff]  ;;  %v3144_v33 = vpack.i.bf16 %v1399_v40, %v1398_v18  ;;  %v3169_v21 = vpack.i.bf16 %v1448_v3, %v1399_v40 }
 0x26a   :  { %v3184_v45 = vpack.i.bf16 %v1413_v4, %v1460_v24  ;;  %v1415_v27 = vld [vmem:[#allocation3 + $0x122] sm:$0xff]  ;;  %v3199_v63 = vpack.i.bf16 %v1414_v46, %v1413_v4 }
 0x26b   :  { %3120 = vrot.lane.b32.xlu1 %v3119_v11, %s3253_s24  ;;  %v3149_v48 = vpack.i.bf16 %v1415_v27, %v1414_v46  ;;  %v3204_v9 = vpack.i.bf16 %v1464_v41, %v1415_v27 }
 0x26c   :  { %3135 = vrot.lane.b32.xlu0 %v3129_v52, %s3246_s28 }
 0x26f   :  { %3125 = vrot.lane.b32.xlu1 %v3119_v11, %s3244_s26 }
 0x270   :  { %3175 = vrot.lane.b32.xlu0 %v3174_v34, %s3248_s9 }
 0x273   :  { %3140 = vrot.lane.b32.xlu1 %v3139_v36, %s3248_s9 }
 0x274   :  { %3180 = vrot.lane.b32.xlu0 %v3179_v37, %s3250_s13 }
 0x277   :  { %3145 = vrot.lane.b32.xlu1 %v3144_v33, %s3250_s13  ;;  %v2891_v39 = vpop.permute.xlu0 %2890 }
 0x278   :  { %3185 = vrot.lane.b32.xlu0 %v3184_v45, %s3251_s2  ;;  %v4087_v44 = vpop.permute.xlu1 %2900  ;;  %v2893_v28 = vunpack.i.h.bf16 %v2891_v39  ;;  %v2892_v5 = vunpack.i.l.bf16 %v2891_v39 }
 0x279   :  { %v2903_v10 = vunpack.i.h.bf16 %v4087_v44  ;;  %v2902_v57 = vunpack.i.l.bf16 %v4087_v44 }
 0x27a   :  { %v1977_v49 = vsel %vm74_vm0, %v1320_v43, %v2892_v5  ;;  %v1978_v14 = vsel %vm74_vm0, %v3952_v30, %v2893_v28 }
 0x27b   :  { %3150 = vrot.lane.b32.xlu1 %v3149_v48, %s3251_s2  ;;  %v2896_v56 = vpop.permute.xlu0 %2895 }
 0x27c   :  { %3190 = vrot.lane.b32.xlu0 %v3189_v50, %s3252_s21  ;;  %v4093_v58 = vpop.permute.xlu1 %2905  ;;  %v2898_v12 = vunpack.i.h.bf16 %v2896_v56  ;;  %v2897_v51 = vunpack.i.l.bf16 %v2896_v56 }
 0x27d   :  { %v2908_v28 = vunpack.i.h.bf16 %v4093_v58  ;;  %v2907_v5 = vunpack.i.l.bf16 %v4093_v58 }
 0x27e   :  { %v1993_v36 = vsel %vm1041_vm6, %v1977_v49, %v2897_v51  ;;  %v1994_v37 = vsel %vm1041_vm6, %v1978_v14, %v2898_v12 }
 0x27f   :  { %3155 = vrot.lane.b32.xlu1 %v3154_v59, %s3252_s21  ;;  %v2926_v19 = vpop.permute.xlu0 %2925 }
 0x280   :  { %3195 = vrot.lane.b32.xlu0 %v3194_v61, %s3253_s24  ;;  %v4097_v62 = vpop.permute.xlu1 %2910  ;;  %v2928_v15 = vunpack.i.h.bf16 %v2926_v19  ;;  %v2927_v16 = vunpack.i.l.bf16 %v2926_v19 }
 0x282   :  { %v2009_v30 = vsel %vm1075_vm8, %v1993_v36, %v2927_v16  ;;  %v2010_v18 = vsel %vm1075_vm8, %v1994_v37, %v2928_v15 }
 0x283   :  { %3160 = vrot.lane.b32.xlu1 %v3194_v61, %s3244_s26  ;;  %v2931_v0 = vpop.permute.xlu0 %2930 }
 0x284   :  { %3200 = vrot.lane.b32.xlu0 %v3199_v63, %s3254_s27  ;;  %v2916_v23 = vpop.permute.xlu1 %2915  ;;  %v2933_v38 = vunpack.i.h.bf16 %v2931_v0  ;;  %v2932_v24 = vunpack.i.l.bf16 %v2931_v0 }
 0x285   :  { %v2918_v2 = vunpack.i.h.bf16 %v2916_v23  ;;  %v2917_v52 = vunpack.i.l.bf16 %v2916_v23 }
 0x286   :  { %v2025_v27 = vsel %vm1109_vm10, %v2009_v30, %v2932_v24  ;;  %v2026_v39 = vsel %vm1109_vm10, %v2010_v18, %v2933_v38 }
 0x287   :  { %3165 = vrot.lane.b32.xlu1 %v3199_v63, %s3246_s28  ;;  %v2936_v32 = vpop.permute.xlu0 %2935  ;;  %v1980_v44 = vsel %vm74_vm0, %v3937_v17, %v2918_v2  ;;  %v1979_v46 = vsel %vm74_vm0, %v3948_v60, %v2917_v52 }
 0x288   :  { %v2921_v13 = vpop.permute.xlu1 %2920  ;;  %v2938_v22 = vunpack.i.h.bf16 %v2936_v32  ;;  %v2937_v11 = vunpack.i.l.bf16 %v2936_v32 }
 0x289   :  { %v2923_v34 = vunpack.i.h.bf16 %v2921_v13  ;;  %v2922_v25 = vunpack.i.l.bf16 %v2921_v13 }
 0x28a   :  { %v2042_v48 = vsel %vm2041_vm15, %v2025_v27, %v2937_v11  ;;  %v2043_v50 = vsel %vm2041_vm15, %v2026_v39, %v2938_v22 }
 0x28b   :  { %3170 = vrot.lane.b32.xlu1 %v3169_v21, %s3253_s24  ;;  %v2941_v7 = vpop.permute.xlu0 %2940  ;;  %v1995_v53 = vsel %vm1041_vm6, %v1979_v46, %v2922_v25  ;;  %v1996_v56 = vsel %vm1041_vm6, %v1980_v44, %v2923_v34 }
 0x28c   :  { %v2943_v40 = vunpack.i.h.bf16 %v2941_v7  ;;  %v2942_v4 = vunpack.i.l.bf16 %v2941_v7  ;;  %v2011_v60 = vsel %vm1075_vm8, %v1995_v53, %v2902_v57  ;;  %v2012_v3 = vsel %vm1075_vm8, %v1996_v56, %v2903_v10 }
 0x28d   :  { %v2027_v51 = vsel %vm1109_vm10, %v2011_v60, %v2907_v5  ;;  %v2028_v13 = vsel %vm1109_vm10, %v2012_v3, %v2908_v28  ;;  %v2913_v10 = vunpack.i.h.bf16 %v4097_v62  ;;  %v2912_v57 = vunpack.i.l.bf16 %v4097_v62 }
 0x28e   :  { %v2059_v61 = vsel %vm2058_vm1, %v2042_v48, %v2942_v4  ;;  %v2060_v19 = vsel %vm2058_vm1, %v2043_v50, %v2943_v40 }
 0x28f   :  { %3205 = vrot.lane.b32.xlu1 %v3204_v9, %s3254_s27  ;;  %v2946_v31 = vpop.permute.xlu0 %2945  ;;  %v2044_v15 = vsel %vm2041_vm15, %v2027_v51, %v2912_v57  ;;  %v2045_v58 = vsel %vm2041_vm15, %v2028_v13, %v2913_v10 }
 0x290   :  { %v2948_v33 = vunpack.i.h.bf16 %v2946_v31  ;;  %v2947_v45 = vunpack.i.l.bf16 %v2946_v31 }
 0x292   :  { %v2076_v17 = vsel %vm2075_vm2, %v2059_v61, %v2947_v45  ;;  %v2077_v23 = vsel %vm2075_vm2, %v2060_v19, %v2948_v33 }
 0x293   :  { %v2951_v59 = vpop.permute.xlu0 %2950 }
 0x294   :  { %v2953_v63 = vunpack.i.h.bf16 %v2951_v59  ;;  %v2952_v0 = vunpack.i.l.bf16 %v2951_v59 }
 0x296   :  { %v2093_v32 = vsel %vm2092_vm3, %v2076_v17, %v2952_v0  ;;  %v2094_v41 = vsel %vm2092_vm3, %v2077_v23, %v2953_v63 }
 0x297   :  { %v2956_v21 = vpop.permute.xlu1 %2955  ;;  %v2109_v7 = vpack.c.bf16 %v2094_v41, %v2093_v32 }
 0x298   :  { %v2971_v43 = vpop.permute.xlu0 %2970  ;;  %v2958_v9 = vunpack.i.h.bf16 %v2956_v21  ;;  %v2957_v12 = vunpack.i.l.bf16 %v2956_v21 }
 0x299   :  { %2495 = vmatprep.mubr.msk.bf16.mxu1 %vm2160_vm4, %v2109_v7  ;;  %v2973_v52 = vunpack.i.h.bf16 %v2971_v43  ;;  %v2972_v22 = vunpack.i.l.bf16 %v2971_v43 }
 0x29a   :  { %v2061_v24 = vsel %vm2058_vm1, %v2044_v15, %v2957_v12  ;;  %v2062_v2 = vsel %vm2058_vm1, %v2045_v58, %v2958_v9 }
 0x29b   :  { %v2961_v49 = vpop.permute.xlu1 %2960 }
 0x29c   :  { %v2976_v14 = vpop.permute.xlu0 %2975  ;;  %v2963_v16 = vunpack.i.h.bf16 %v2961_v49  ;;  %v2962_v38 = vunpack.i.l.bf16 %v2961_v49 }
 0x29d   :  { %v2978_v59 = vunpack.i.h.bf16 %v2976_v14  ;;  %v2977_v61 = vunpack.i.l.bf16 %v2976_v14 }
 0x29e   :  { %v2078_v11 = vsel %vm2075_vm2, %v2061_v24, %v2962_v38  ;;  %v2079_v34 = vsel %vm2075_vm2, %v2062_v2, %v2963_v16 }
 0x29f   :  { %v2966_v25 = vpop.permute.xlu1 %2965  ;;  %v2095_v31 = vsel %vm2092_vm3, %v2078_v11, %v2972_v22  ;;  %v2096_v36 = vsel %vm2092_vm3, %v2079_v34, %v2973_v52 }
 0x2a0   :  { %v4144_v62 = vpop.permute.xlu0 %3005  ;;  %v2110_v37 = vpack.c.bf16 %v2096_v36, %v2095_v31  ;;  %v2968_v27 = vunpack.i.h.bf16 %v2966_v25  ;;  %v2967_v39 = vunpack.i.l.bf16 %v2966_v25 }
 0x2a2   :  { %2496 = vmatmul.mubr.msk.bf16.vlgmr.msra.gmra.mrb[0].mxu1 %vm2160_vm4, %v2110_v37  ;;  %v1982_v48 = vsel %vm74_vm0, %v3990_v1, %v2968_v27  ;;  %v1981_v50 = vsel %vm74_vm0, %v3939_v6, %v2967_v39 }
 0x2a3   :  { %v4149_v40 = vpop.permute.xlu1 %2980  ;;  %v1997_v3 = vsel %vm1041_vm6, %v1981_v50, %v2977_v61  ;;  %v1998_v32 = vsel %vm1041_vm6, %v1982_v48, %v2978_v59 }
 0x2a4   :  { %v3021_v4 = vpop.permute.xlu0 %3020  ;;  %v2983_v31 = vunpack.i.h.bf16 %v4149_v40  ;;  %v2982_v36 = vunpack.i.l.bf16 %v4149_v40 }
 0x2a5   :  { %v3023_v53 = vunpack.i.h.bf16 %v3021_v4  ;;  %v3022_v56 = vunpack.i.l.bf16 %v3021_v4 }
 0x2a7   :  { %v4151_v30 = vpop.permute.xlu1 %2985  ;;  %v2013_v28 = vsel %vm1075_vm8, %v1997_v3, %v3022_v56  ;;  %v2014_v6 = vsel %vm1075_vm8, %v1998_v32, %v3023_v53 }
 0x2a8   :  { %v3026_v18 = vpop.permute.xlu0 %3025 }
 0x2a9   :  { %v3028_v19 = vunpack.i.h.bf16 %v3026_v18  ;;  %v3027_v63 = vunpack.i.l.bf16 %v3026_v18  ;;  %v2988_v18 = vunpack.i.h.bf16 %v4151_v30 }
 0x2ab   :  { %v4153_v33 = vpop.permute.xlu1 %2990  ;;  %v2029_v43 = vsel %vm1109_vm10, %v2013_v28, %v3027_v63  ;;  %v2030_v7 = vsel %vm1109_vm10, %v2014_v6, %v3028_v19  ;;  %v1328_v6 = vld [vmem:[#allocation3 + $0xa0] sm:$0xff] }
 0x2ac   :  { %v3031_v45 = vpop.permute.xlu0 %3030  ;;  %v2992_v40 = vunpack.i.l.bf16 %v4153_v33 }
 0x2ad   :  { %v3033_v0 = vunpack.i.h.bf16 %v3031_v45  ;;  %v3032_v17 = vunpack.i.l.bf16 %v3031_v45  ;;  %v2987_v45 = vunpack.i.l.bf16 %v4151_v30 }
 0x2af   :  { %v4155_v44 = vpop.permute.xlu1 %2995  ;;  %v2046_v9 = vsel %vm2041_vm15, %v2029_v43, %v3032_v17  ;;  %v2047_v12 = vsel %vm2041_vm15, %v2030_v7, %v3033_v0  ;;  %v3008_v0 = vunpack.i.h.bf16 %v4144_v62  ;;  %v3007_v17 = vunpack.i.l.bf16 %v4144_v62 }
 0x2b0   :  { %v3036_v46 = vpop.permute.xlu0 %3035  ;;  %v2998_v53 = vunpack.i.h.bf16 %v4155_v44  ;;  %v2997_v56 = vunpack.i.l.bf16 %v4155_v44 }
 0x2b1   :  { %v3038_v41 = vunpack.i.h.bf16 %v3036_v46  ;;  %v3037_v1 = vunpack.i.l.bf16 %v3036_v46  ;;  %v2993_v46 = vunpack.i.h.bf16 %v4153_v33 }
 0x2b3   :  { %v4161_v23 = vpop.permute.xlu1 %3000  ;;  %v2063_v10 = vsel %vm2058_vm1, %v2046_v9, %v3037_v1  ;;  %v2064_v57 = vsel %vm2058_vm1, %v2047_v12, %v3038_v41 }
 0x2b4   :  { %v3041_v60 = vpop.permute.xlu0 %3040  ;;  %v3003_v61 = vunpack.i.h.bf16 %v4161_v23  ;;  %v3002_v19 = vunpack.i.l.bf16 %v4161_v23 }
 0x2b5   :  { %v3043_v5 = vunpack.i.h.bf16 %v3041_v60  ;;  %v3042_v21 = vunpack.i.l.bf16 %v3041_v60 }
 0x2b7   :  { %v3011_v51 = vpop.permute.xlu1 %3010  ;;  %v2080_v15 = vsel %vm2075_vm2, %v2063_v10, %v3042_v21  ;;  %v2081_v58 = vsel %vm2075_vm2, %v2064_v57, %v3043_v5 }
 0x2b8   :  { %v3046_v13 = vpop.permute.xlu0 %3045  ;;  %v3013_v16 = vunpack.i.h.bf16 %v3011_v51  ;;  %v3012_v38 = vunpack.i.l.bf16 %v3011_v51 }
 0x2b9   :  { %v3048_v49 = vunpack.i.h.bf16 %v3046_v13  ;;  %v3047_v14 = vunpack.i.l.bf16 %v3046_v13 }
 0x2ba   :  { %v1984_v37 = vsel %vm74_vm0, %v4003_v8, %v3013_v16  ;;  %v1983_v4 = vsel %vm74_vm0, %v3999_v42, %v3012_v38 }
 0x2bb   :  { %v2097_v24 = vsel %vm2092_vm3, %v2080_v15, %v3047_v14  ;;  %v2098_v2 = vsel %vm2092_vm3, %v2081_v58, %v3048_v49  ;;  %v3016_v22 = vpop.permute.xlu1 %3015 }
 0x2bc   :  { %v2111_v52 = vpack.c.bf16 %v2098_v2, %v2097_v24  ;;  %v3056_v11 = vpop.permute.xlu0 %3055  ;;  %v3018_v34 = vunpack.i.h.bf16 %v3016_v22  ;;  %v3017_v25 = vunpack.i.l.bf16 %v3016_v22 }
 0x2bd   :  { %v3058_v51 = vunpack.i.h.bf16 %v3056_v11  ;;  %v3057_v13 = vunpack.i.l.bf16 %v3056_v11 }
 0x2be   :  { %2499 = vmatprep.mubr.msk.bf16.mxu1 %vm2160_vm4, %v2111_v52  ;;  %v1999_v27 = vsel %vm1041_vm6, %v1983_v4, %v3017_v25  ;;  %v2000_v39 = vsel %vm1041_vm6, %v1984_v37, %v3018_v34 }
 0x2bf   :  { %v2015_v48 = vsel %vm1075_vm8, %v1999_v27, %v2982_v36  ;;  %v2016_v8 = vsel %vm1075_vm8, %v2000_v39, %v2983_v31  ;;  %v3051_v50 = vpop.permute.xlu1 %3050 }
 0x2c0   :  { %v3086_v42 = vpop.permute.xlu0 %3085  ;;  %v2031_v30 = vsel %vm1109_vm10, %v2015_v48, %v2987_v45  ;;  %v2032_v59 = vsel %vm1109_vm10, %v2016_v8, %v2988_v18  ;;  %v3053_v3 = vunpack.i.h.bf16 %v3051_v50  ;;  %v3052_v32 = vunpack.i.l.bf16 %v3051_v50 }
 0x2c1   :  { %v2048_v33 = vsel %vm2041_vm15, %v2031_v30, %v2992_v40  ;;  %v2049_v63 = vsel %vm2041_vm15, %v2032_v59, %v2993_v46  ;;  %v3088_v49 = vunpack.i.h.bf16 %v3086_v42  ;;  %v3087_v14 = vunpack.i.l.bf16 %v3086_v42 }
 0x2c2   :  { %v2065_v60 = vsel %vm2058_vm1, %v2048_v33, %v2997_v56  ;;  %v2066_v44 = vsel %vm2058_vm1, %v2049_v63, %v2998_v53  ;;  %v1986_v62 = vsel %vm74_vm0, %v4034_v55, %v3053_v3  ;;  %v1985_v7 = vsel %vm74_vm0, %v1328_v6, %v3052_v32 }
 0x2c3   :  { %v3061_v41 = vpop.permute.xlu1 %3060  ;;  %v2082_v28 = vsel %vm2075_vm2, %v2065_v60, %v3002_v19  ;;  %v2083_v23 = vsel %vm2075_vm2, %v2066_v44, %v3003_v61  ;;  %v2001_v10 = vsel %vm1041_vm6, %v1985_v7, %v3057_v13  ;;  %v2002_v57 = vsel %vm1041_vm6, %v1986_v62, %v3058_v51 }
 0x2c4   :  { %v3091_v1 = vpop.permute.xlu0 %3090  ;;  %v2099_v5 = vsel %vm2092_vm3, %v2082_v28, %v3007_v17  ;;  %v2100_v21 = vsel %vm2092_vm3, %v2083_v23, %v3008_v0  ;;  %v2017_v55 = vsel %vm1075_vm8, %v2001_v10, %v3087_v14  ;;  %v2018_v24 = vsel %vm1075_vm8, %v2002_v57, %v3088_v49 }
 0x2c5   :  { %v2112_v43 = vpack.c.bf16 %v2100_v21, %v2099_v5  ;;  %v3093_v16 = vunpack.i.h.bf16 %v3091_v1  ;;  %v3092_v38 = vunpack.i.l.bf16 %v3091_v1  ;;  %v3063_v27 = vunpack.i.h.bf16 %v3061_v41 }
 0x2c6   :  { %v3062_v40 = vunpack.i.l.bf16 %v3061_v41 }
 0x2c7   :  { %v3066_v9 = vpop.permute.xlu1 %3065  ;;  %2500 = vmatmul.mubr.msk.bf16.gmra.mrb[4].mxu1 %vm2160_vm4, %v2112_v43  ;;  %v2033_v31 = vsel %vm1109_vm10, %v2017_v55, %v3092_v38  ;;  %v2034_v36 = vsel %vm1109_vm10, %v2018_v24, %v3093_v16 }
 0x2c8   :  { %v3096_v12 = vpop.permute.xlu0 %3095  ;;  %v3068_v48 = vunpack.i.h.bf16 %v3066_v9  ;;  %v3067_v32 = vunpack.i.l.bf16 %v3066_v9 }
 0x2c9   :  { %v3098_v2 = vunpack.i.h.bf16 %v3096_v12  ;;  %v3097_v52 = vunpack.i.l.bf16 %v3096_v12 }
 0x2cb   :  { %v3071_v15 = vpop.permute.xlu1 %3070  ;;  %v2050_v39 = vsel %vm2041_vm15, %v2033_v31, %v3097_v52  ;;  %v2051_v46 = vsel %vm2041_vm15, %v2034_v36, %v3098_v2 }
 0x2cc   :  { %v3101_v58 = vpop.permute.xlu0 %3100  ;;  %v3073_v5 = vunpack.i.h.bf16 %v3071_v15  ;;  %v3072_v21 = vunpack.i.l.bf16 %v3071_v15 }
 0x2cd   :  { %v3103_v22 = vunpack.i.h.bf16 %v3101_v58  ;;  %v3102_v11 = vunpack.i.l.bf16 %v3101_v58 }
 0x2cf   :  { %v3076_v34 = vpop.permute.xlu1 %3075  ;;  %v2067_v8 = vsel %vm2058_vm1, %v2050_v39, %v3102_v11  ;;  %v2068_v50 = vsel %vm2058_vm1, %v2051_v46, %v3103_v22 }
 0x2d0   :  { %v3106_v25 = vpop.permute.xlu0 %3105  ;;  %v3078_v37 = vunpack.i.h.bf16 %v3076_v34  ;;  %v3077_v4 = vunpack.i.l.bf16 %v3076_v34 }
 0x2d1   :  { %v3108_v18 = vunpack.i.h.bf16 %v3106_v25  ;;  %v3107_v45 = vunpack.i.l.bf16 %v3106_v25 }
 0x2d2   :  { %v1988_v19 = vsel %vm74_vm0, %v4042_v26, %v3078_v37  ;;  %v1987_v33 = vsel %vm74_vm0, %v4030_v54, %v3077_v4 }
 0x2d3   :  { %v3081_v42 = vpop.permute.xlu1 %3080  ;;  %v2084_v63 = vsel %vm2075_vm2, %v2067_v8, %v3107_v45  ;;  %v2085_v0 = vsel %vm2075_vm2, %v2068_v50, %v3108_v18 }
 0x2d4   :  { %v3111_v53 = vpop.permute.xlu0 %3110  ;;  %v3083_v56 = vunpack.i.h.bf16 %v3081_v42  ;;  %v3082_v30 = vunpack.i.l.bf16 %v3081_v42 }
 0x2d5   :  { %v3113_v59 = vunpack.i.h.bf16 %v3111_v53  ;;  %v3112_v61 = vunpack.i.l.bf16 %v3111_v53 }
 0x2d6   :  { %v2003_v17 = vsel %vm1041_vm6, %v1987_v33, %v3082_v30  ;;  %v2004_v60 = vsel %vm1041_vm6, %v1988_v19, %v3083_v56 }
 0x2d7   :  { %v2101_v44 = vsel %vm2092_vm3, %v2084_v63, %v3112_v61  ;;  %v2102_v3 = vsel %vm2092_vm3, %v2085_v0, %v3113_v59  ;;  %v2019_v41 = vsel %vm1075_vm8, %v2003_v17, %v3062_v40  ;;  %v2020_v26 = vsel %vm1075_vm8, %v2004_v60, %v3063_v27 }
 0x2d8   :  { %v2113_v1 = vpack.c.bf16 %v2102_v3, %v2101_v44  ;;  %v2035_v54 = vsel %vm1109_vm10, %v2019_v41, %v3067_v32  ;;  %v2036_v23 = vsel %vm1109_vm10, %v2020_v26, %v3068_v48 }
 0x2d9   :  { %v3116_v28 = vpop.permute.xlu1 %3115  ;;  %v2052_v7 = vsel %vm2041_vm15, %v2035_v54, %v3072_v21  ;;  %v2053_v9 = vsel %vm2041_vm15, %v2036_v23, %v3073_v5 }
 0x2da   :  { %v3131_v6 = vpop.permute.xlu0 %3130  ;;  %2503 = vmatprep.mubr.msk.bf16.mxu1 %vm2160_vm4, %v2113_v1  ;;  %v3118_v43 = vunpack.i.h.bf16 %v3116_v28  ;;  %v3117_v62 = vunpack.i.l.bf16 %v3116_v28 }
 0x2db   :  { %v3133_v14 = vunpack.i.h.bf16 %v3131_v6  ;;  %v3132_v58 = vunpack.i.l.bf16 %v3131_v6 }
 0x2dc   :  { %v2069_v57 = vsel %vm2058_vm1, %v2052_v7, %v3117_v62  ;;  %v2070_v49 = vsel %vm2058_vm1, %v2053_v9, %v3118_v43 }
 0x2dd   :  { %v3121_v12 = vpop.permute.xlu1 %3120 }
 0x2de   :  { %v3136_v51 = vpop.permute.xlu0 %3135  ;;  %v3123_v13 = vunpack.i.h.bf16 %v3121_v12  ;;  %v3122_v10 = vunpack.i.l.bf16 %v3121_v12 }
 0x2df   :  { %v3138_v18 = vunpack.i.h.bf16 %v3136_v51  ;;  %v3137_v45 = vunpack.i.l.bf16 %v3136_v51 }
 0x2e0   :  { %v2086_v16 = vsel %vm2075_vm2, %v2069_v57, %v3122_v10  ;;  %v2087_v15 = vsel %vm2075_vm2, %v2070_v49, %v3123_v13 }
 0x2e1   :  { %v3126_v38 = vpop.permute.xlu1 %3125  ;;  %v2103_v24 = vsel %vm2092_vm3, %v2086_v16, %v3132_v58  ;;  %v2104_v2 = vsel %vm2092_vm3, %v2087_v15, %v3133_v14 }
 0x2e2   :  { %v3176_v55 = vpop.permute.xlu0 %3175  ;;  %v2114_v52 = vpack.c.bf16 %v2104_v2, %v2103_v24  ;;  %v3128_v34 = vunpack.i.h.bf16 %v3126_v38  ;;  %v3127_v25 = vunpack.i.l.bf16 %v3126_v38 }
 0x2e3   :  { %v3178_v48 = vunpack.i.h.bf16 %v3176_v55  ;;  %v3177_v8 = vunpack.i.l.bf16 %v3176_v55 }
 0x2e4   :  { %2504 = vmatmul.mubr.msk.bf16.gmra.mrb[8].mxu1 %vm2160_vm4, %v2114_v52  ;;  %v1990_v37 = vsel %vm74_vm0, %v4066_v47, %v3128_v34  ;;  %v1989_v4 = vsel %vm74_vm0, %v4038_v20, %v3127_v25 }
 0x2e5   :  { %v3141_v22 = vpop.permute.xlu1 %3140  ;;  %v2005_v46 = vsel %vm1041_vm6, %v1989_v4, %v3137_v45  ;;  %v2006_v40 = vsel %vm1041_vm6, %v1990_v37, %v3138_v18 }
 0x2e6   :  { %v3181_v11 = vpop.permute.xlu0 %3180  ;;  %v2021_v53 = vsel %vm1075_vm8, %v2005_v46, %v3177_v8  ;;  %v2022_v56 = vsel %vm1075_vm8, %v2006_v40, %v3178_v48  ;;  %v3143_v51 = vunpack.i.h.bf16 %v3141_v22  ;;  %v3142_v13 = vunpack.i.l.bf16 %v3141_v22  ;;  %v2346_v8 = vld [vmem:[%s4324_s4] ss:$0 sm:$0xff]  ;;  %s3255_s4 = smov [#allocation4]  }
 0x2e7   :  { %v3183_v50 = vunpack.i.h.bf16 %v3181_v11  ;;  %v3182_v42 = vunpack.i.l.bf16 %v3181_v11  ;;  %s2323_s29 = sshll.u32 %s3255_s4, 4  ;;  %s2324_s29 = int_to_ptr.vmem [resolvable:$true] %s2323_s29 }
 0x2e8   :  { %s3217_s30 = scalar_lea.vmem %s2324_s29, 2048  ;;  %p3222_p1 = scmp.lt.s32.totalorder %s2324_s29, %s2324_s29 }
 0x2e9   :  { %v4246_v31 = vpop.permute.xlu1 %3145  ;;  %v2037_v0 = vsel %vm1109_vm10, %v2021_v53, %v3182_v42  ;;  %v2038_v17 = vsel %vm1109_vm10, %v2022_v56, %v3183_v50  ;;  %p3218_p0 = scmp.ne.s32.totalorder %s2324_s29, %s3217_s30  ;;  %p3223_p2 = scmp.lt.s32.totalorder %s3217_s30, %s3217_s30 }
 0x2ea   :  { %v3186_v36 = vpop.permute.xlu0 %3185  ;;  %v3148_v49 = vunpack.i.h.bf16 %v4246_v31  ;;  %v3147_v14 = vunpack.i.l.bf16 %v4246_v31 }
 0x2eb   :  { %v3188_v47 = vunpack.i.h.bf16 %v3186_v36  ;;  %v3187_v30 = vunpack.i.l.bf16 %v3186_v36  ;;  %p3224_p3 = por %p3223_p2, %p3222_p1 }
 0x2ed   :  { %v3151_v27 = vpop.permute.xlu1 %3150  ;;  %v2054_v60 = vsel %vm2041_vm15, %v2037_v0, %v3187_v30  ;;  %v2055_v44 = vsel %vm2041_vm15, %v2038_v17, %v3188_v47  ;;  %p3225_p4 = pnand %p3224_p3, %p3218_p0 }
 0x2ee   :  { %v3191_v39 = vpop.permute.xlu0 %3190  ;;  %v3153_v15 = vunpack.i.h.bf16 %v3151_v27  ;;  %v3152_v38 = vunpack.i.l.bf16 %v3151_v27 }
 0x2ef   :  { %v3193_v61 = vunpack.i.h.bf16 %v3191_v39  ;;  %v3192_v19 = vunpack.i.l.bf16 %v3191_v39 }
 0x2f1   :  { %v3156_v59 = vpop.permute.xlu1 %3155  ;;  %v2071_v41 = vsel %vm2058_vm1, %v2054_v60, %v3192_v19  ;;  %v2072_v26 = vsel %vm2058_vm1, %v2055_v44, %v3193_v61 }
 0x2f2   :  { %v3196_v20 = vpop.permute.xlu0 %3195  ;;  %v3158_v2 = vunpack.i.h.bf16 %v3156_v59  ;;  %v3157_v52 = vunpack.i.l.bf16 %v3156_v59 }
 0x2f3   :  { %v3198_v33 = vunpack.i.h.bf16 %v3196_v20  ;;  %v3197_v63 = vunpack.i.l.bf16 %v3196_v20 }
 0x2f5   :  { %v3161_v3 = vpop.permute.xlu1 %3160  ;;  %v2088_v54 = vsel %vm2075_vm2, %v2071_v41, %v3197_v63  ;;  %v2089_v23 = vsel %vm2075_vm2, %v2072_v26, %v3198_v33 }
 0x2f6   :  { %v3201_v32 = vpop.permute.xlu0 %3200  ;;  %v3163_v6 = vunpack.i.h.bf16 %v3161_v3  ;;  %v3162_v5 = vunpack.i.l.bf16 %v3161_v3 }
 0x2f7   :  { %v3203_v1 = vunpack.i.h.bf16 %v3201_v32  ;;  %v3202_v28 = vunpack.i.l.bf16 %v3201_v32 }
 0x2f8   :  { %v1992_v10 = vsel %vm74_vm0, %v4080_v35, %v3163_v6  ;;  %v1991_v57 = vsel %vm74_vm0, %v4072_v29, %v3162_v5 }
 0x2f9   :  { %v2105_v21 = vsel %vm2092_vm3, %v2088_v54, %v3202_v28  ;;  %v2106_v43 = vsel %vm2092_vm3, %v2089_v23, %v3203_v1  ;;  %v3166_v7 = vpop.permute.xlu1 %3165 }
 0x2fa   :  { %v2115_v62 = vpack.c.bf16 %v2106_v43, %v2105_v21  ;;  %v3168_v9 = vunpack.i.h.bf16 %v3166_v7  ;;  %v3167_v12 = vunpack.i.l.bf16 %v3166_v7 }
 0x2fc   :  { %2507 = vmatprep.mubr.msk.bf16.mxu1 %vm2160_vm4, %v2115_v62  ;;  %v2007_v58 = vsel %vm1041_vm6, %v1991_v57, %v3167_v12  ;;  %v2008_v16 = vsel %vm1041_vm6, %v1992_v10, %v3168_v9 }
 0x2fd   :  { %v2023_v55 = vsel %vm1075_vm8, %v2007_v58, %v3142_v13  ;;  %v2024_v24 = vsel %vm1075_vm8, %v2008_v16, %v3143_v51  ;;  %v3171_v35 = vpop.permute.xlu1 %3170 }
 0x2fe   :  { %v2039_v29 = vsel %vm1109_vm10, %v2023_v55, %v3147_v14  ;;  %v2040_v22 = vsel %vm1109_vm10, %v2024_v24, %v3148_v49  ;;  %v3173_v11 = vunpack.i.h.bf16 %v3171_v35  ;;  %v3172_v34 = vunpack.i.l.bf16 %v3171_v35 }
 0x2ff   :  { %v2056_v25 = vsel %vm2041_vm15, %v2039_v29, %v3152_v38  ;;  %v2057_v31 = vsel %vm2041_vm15, %v2040_v22, %v3153_v15 }
 0x300   :  { %v2073_v36 = vsel %vm2058_vm1, %v2056_v25, %v3157_v52  ;;  %v2074_v37 = vsel %vm2058_vm1, %v2057_v31, %v3158_v2 }
 0x301   :  { %v3206_v4 = vpop.permute.xlu1 %3205  ;;  %v2090_v27 = vsel %vm2075_vm2, %v2073_v36, %v3172_v34  ;;  %v2091_v39 = vsel %vm2075_vm2, %v2074_v37, %v3173_v11 }
 0x302   :  { %v3208_v18 = vunpack.i.h.bf16 %v3206_v4  ;;  %v3207_v45 = vunpack.i.l.bf16 %v3206_v4 }
 0x304   :  { %v2107_v46 = vsel %vm2092_vm3, %v2090_v27, %v3207_v45  ;;  %v2108_v40 = vsel %vm2092_vm3, %v2091_v39, %v3208_v18 }
 0x305   :  { %v2116_v48 = vpack.c.bf16 %v2108_v40, %v2107_v46 }
 0x307   :  { %2508 = vmatmul.mubr.msk.bf16.gmra.mrb[12].mxu1 %vm2160_vm4, %v2116_v48 }
 0x375   :  { %v2497_v50 = vpop.f32.mrb[0].mxu1 }
 0x376   :  { %v2232_v42 = vadd.f32 %v2497_v50, %v2346_v8  ;;  %v2223_v53 = vpop.f32.mrb[1].mxu1 }
 0x377   :  { %v2224_v56 = vadd.f32 %v2346_v8, %v2223_v53  ;;  %v2498_v47 = vpop.f32.mrb[2].mxu1 }
 0x378   :  { %v2288_v30 = vmax.f32 %v2232_v42, 0.0  ;;  %v2235_v59 = vadd.f32 %v2498_v47, %v2346_v8  ;;  %v2226_v20 = vpop.f32.mrb[3].mxu1 }
 0x379   :  { %v2286_v61 = vmax.f32 %v2224_v56, 0.0  ;;  %v2227_v19 = vadd.f32 %v2346_v8, %v2226_v20 }
 0x37a   :  { %2304 = vst.msk [vmem:[#allocation4 + $0x10] sm:$0xff] %vm74_vm0, %v2288_v30  ;;  %v2289_v33 = vmax.f32 %v2235_v59, 0.0 }
 0x37b   :  { %2302 = vst.msk [vmem:[#allocation4] sm:$0xff] %vm74_vm0, %v2286_v61  ;;  %v2287_v63 = vmax.f32 %v2227_v19, 0.0 }
 0x37c   :  { %2305 = vst.msk [vmem:[#allocation4 + $0x18] sm:$0xff] %vm74_vm0, %v2289_v33 }
 0x37d   :  { %2303 = vst.msk [vmem:[#allocation4 + $0x8] sm:$0xff] %vm74_vm0, %v2287_v63 }
 0x39a   :  { %v2501_v0 = vpop.f32.mrb[4].mxu1 }
 0x39b   :  { %v2248_v17 = vadd.f32 %v2501_v0, %v2346_v8  ;;  %v2239_v60 = vpop.f32.mrb[5].mxu1 }
 0x39c   :  { %v2240_v44 = vadd.f32 %v2346_v8, %v2239_v60  ;;  %v2502_v3 = vpop.f32.mrb[6].mxu1 }
 0x39d   :  { %v2292_v32 = vmax.f32 %v2248_v17, 0.0  ;;  %v2251_v41 = vadd.f32 %v2502_v3, %v2346_v8  ;;  %v2242_v26 = vpop.f32.mrb[7].mxu1 }
 0x39e   :  { %v2290_v1 = vmax.f32 %v2240_v44, 0.0  ;;  %v2243_v28 = vadd.f32 %v2346_v8, %v2242_v26 }
 0x39f   :  { %2308 = vst.msk [vmem:[#allocation4 + $0x30] sm:$0xff] %vm74_vm0, %v2292_v32  ;;  %v2293_v54 = vmax.f32 %v2251_v41, 0.0 }
 0x3a0   :  { %2306 = vst.msk [vmem:[#allocation4 + $0x20] sm:$0xff] %vm74_vm0, %v2290_v1  ;;  %v2291_v23 = vmax.f32 %v2243_v28, 0.0 }
 0x3a1   :  { %2309 = vst.msk [vmem:[#allocation4 + $0x38] sm:$0xff] %vm74_vm0, %v2293_v54 }
 0x3a2   :  { %2307 = vst.msk [vmem:[#allocation4 + $0x28] sm:$0xff] %vm74_vm0, %v2291_v23 }
 0x3b7   :  { %v2505_v6 = vpop.f32.mrb[8].mxu1 }
 0x3b8   :  { %v2264_v5 = vadd.f32 %v2505_v6, %v2346_v8  ;;  %v2255_v21 = vpop.f32.mrb[9].mxu1 }
 0x3b9   :  { %v2256_v43 = vadd.f32 %v2346_v8, %v2255_v21  ;;  %v2506_v62 = vpop.f32.mrb[10].mxu1 }
 0x3ba   :  { %v2296_v7 = vmax.f32 %v2264_v5, 0.0  ;;  %v2267_v9 = vadd.f32 %v2506_v62, %v2346_v8  ;;  %v2258_v12 = vpop.f32.mrb[11].mxu1 }
 0x3bb   :  { %v2294_v51 = vmax.f32 %v2256_v43, 0.0  ;;  %v2259_v13 = vadd.f32 %v2346_v8, %v2258_v12 }
 0x3bc   :  { %2312 = vst.msk [vmem:[#allocation4 + $0x50] sm:$0xff] %vm74_vm0, %v2296_v7  ;;  %v2297_v10 = vmax.f32 %v2267_v9, 0.0 }
 0x3bd   :  { %2310 = vst.msk [vmem:[#allocation4 + $0x40] sm:$0xff] %vm74_vm0, %v2294_v51  ;;  %v2295_v57 = vmax.f32 %v2259_v13, 0.0 }
 0x3be   :  { %2313 = vst.msk [vmem:[#allocation4 + $0x58] sm:$0xff] %vm74_vm0, %v2297_v10 }
 0x3bf   :  { %2311 = vst.msk [vmem:[#allocation4 + $0x48] sm:$0xff] %vm74_vm0, %v2295_v57 }
 0x3da   :  { %v2509_v49 = vpop.f32.mrb[12].mxu1 }
 0x3db   :  { %v2280_v14 = vadd.f32 %v2509_v49, %v2346_v8  ;;  %v2271_v58 = vpop.f32.mrb[13].mxu1 }
 0x3dc   :  { %v2272_v16 = vadd.f32 %v2346_v8, %v2271_v58  ;;  %v2510_v15 = vpop.f32.mrb[14].mxu1 }
 0x3dd   :  { %v2300_v38 = vmax.f32 %v2280_v14, 0.0  ;;  %v2283_v55 = vadd.f32 %v2510_v15, %v2346_v8  ;;  %v2274_v24 = vpop.f32.mrb[15].mxu1 }
 0x3de   :  { %v2298_v35 = vmax.f32 %v2272_v16, 0.0  ;;  %v2275_v2 = vadd.f32 %v2346_v8, %v2274_v24 }
 0x3df   :  { %2316 = vst.msk [vmem:[#allocation4 + $0x70] sm:$0xff] %vm74_vm0, %v2300_v38  ;;  %v2301_v52 = vmax.f32 %v2283_v55, 0.0 }
 0x3e0   :  { %2314 = vst.msk [vmem:[#allocation4 + $0x60] sm:$0xff] %vm74_vm0, %v2298_v35  ;;  %v2299_v29 = vmax.f32 %v2275_v2, 0.0 }
 0x3e1   :  { %2317 = vst.msk [vmem:[#allocation4 + $0x78] sm:$0xff] %vm74_vm0, %v2301_v52 }
 0x3e2   :  { %2315 = vst.msk [vmem:[#allocation4 + $0x68] sm:$0xff] %vm74_vm0, %v2299_v29 }
 0x3e3   :  { %3228 = shalt.err (!%p3225_p4)
}
 0x3e4   :  { %s3229_s8 = scalar_lea.hbm %s4325_s5, 2048 }
 0x3e5   :  { %p3230_p5 = scmp.ne.s32.totalorder %s4325_s5, %s3229_s8  ;;  %p3233_p6 = scmp.lt.u32.totalorder %s3229_s8, %s4325_s5 }
 0x3e7   :  { %p3235_p7 = pnand %p3233_p6, %p3230_p5 }
 0x3e9   :  { %3238 = shalt.err (!%p3235_p7)
}
 0x3ea   :  { %s3256_s13 = smov 128  }
 0x3eb   :  { %2329 = dma.vmem_to_hbm [thread:$0]  %s2324_s29, 2048, %s4325_s5, [#allocation5], %s3256_s13, %s3256_s13, %s3244_s26  }
 0x3ec   :  { %3239 = dma.done.wait [#allocation5], 2048  }
 0x3ed   :  { %3240 = vsyncadd [#allocation5], 4294965248 }
 0x3ee   :  { %2333 = vsyncpa [#allocation5], 1 }

</bundles_post_ra>
